<compile_context>
chip_gen: v6e
topology: v6e:2x2x1
jax: 0.10.0
libtpu: 0.0.40
codegen_flags: <defaults>
</compile_context>

<pallas_src>
import functools
import math

import jax
import jax.numpy as jnp
from jax.experimental import pallas as pl
from jax.experimental.pallas import tpu as pltpu


# ----------------------------------------------------------------------------
# Fused kernel: path MHA + P node MHAs + combine, all in VMEM, one store.
# ----------------------------------------------------------------------------
def _metapath_fused_kernel(n_heads, n_paths, emb_dim,
                           x_ref, pw_ref, pb_ref, pow_ref, pob_ref,
                           nw_ref, nb_ref, now_ref, nob_ref, o_ref):
    P, E, H = n_paths, emb_dim, n_heads
    dh = E // H
    f32, bf16 = jnp.float32, jnp.bfloat16

    x = x_ref[...]                                            # (P, N, E) bf16

    # Head-collapse matrices built from iota (no extra kernel inputs):
    #   head_sum[e, h] = 1 iff lane e belongs to head h  -> per-head score sum
    #   head_exp[h, e] = 1 iff lane e belongs to head h  -> per-head prob bcast
    e_row = jax.lax.broadcasted_iota(jnp.int32, (E, H), 0)
    h_col = jax.lax.broadcasted_iota(jnp.int32, (E, H), 1)
    head_sum = ((e_row >= h_col * dh) & (e_row < (h_col + 1) * dh)).astype(f32)
    h_row = jax.lax.broadcasted_iota(jnp.int32, (H, E), 0)
    e_col = jax.lax.broadcasted_iota(jnp.int32, (H, E), 1)
    head_exp = ((e_col >= h_row * dh) & (e_col < (h_row + 1) * dh)).astype(f32)

    def collapse(t4, mat):
        """(A, B, C, Ein) x (Ein, Eout) -> (A, B, C, Eout) via ONE 2-D MXU dot.

        The flatten/unflatten only merges/splits sublane-major leading dims
        (C == 8 fills a sublane group exactly), so the reshapes are layout
        preserving (no data movement).
        """
        a, b, c, e_in = t4.shape
        flat = jnp.dot(t4.reshape(a * b * c, e_in), mat,
                       preferred_element_type=f32)
        return flat.reshape(a, b, c, mat.shape[1])

    # --------- node attention: all P metapaths batched, no per-head loop ---------
    qkv_n = jnp.einsum('pne,pef->pnf', x, nw_ref[...],
                       preferred_element_type=f32) + nb_ref[...]          # (P,N,3E)
    qn = qkv_n[..., :E]                                       # q pre-scaled by 1/sqrt(dh)
    kn = qkv_n[..., E:2 * E]
    vn = qkv_n[..., 2 * E:]
    qk_n = qn[:, :, None, :] * kn[:, None, :, :]                          # (P,N,M,E)
    s_n = collapse(qk_n, head_sum)                                        # (P,N,M,H)
    s_n = s_n - jnp.max(s_n, axis=2, keepdims=True)
    p_n = jnp.exp(s_n)
    p_n = p_n / jnp.sum(p_n, axis=2, keepdims=True)            # exact softmax
    w_n = collapse(p_n, head_exp)                                         # (P,N,M,E)
    ctx_n = jnp.sum(w_n * vn[:, None, :, :], axis=2)                      # (P,N,E)
    local = jnp.einsum('pne,pef->pnf', ctx_n.astype(bf16), now_ref[...],
                       preferred_element_type=f32) + nob_ref[...]         # (P,N,E)

    # --------- path attention: attend across metapaths, batched over (i, j) -------
    qkv_p = jnp.einsum('pne,ef->pnf', x, pw_ref[...],
                       preferred_element_type=f32) + pb_ref[...]          # (P,N,3E)
    qp = qkv_p[..., :E]                                        # pre-scaled
    kp = qkv_p[..., E:2 * E]
    vp = qkv_p[..., 2 * E:]
    qk_p = qp[:, None, :, :] * kp[None, :, :, :]                          # (I,J,N,E)
    s_p = collapse(qk_p, head_sum)                                        # (I,J,N,H)
    s_p = s_p - jnp.max(s_p, axis=1, keepdims=True)             # softmax over sources J
    p_p = jnp.exp(s_p)
    p_p = p_p / jnp.sum(p_p, axis=1, keepdims=True)
    w_p = collapse(p_p, head_exp)                                         # (I,J,N,E)
    ctx_p = jnp.sum(w_p * vp[None, :, :, :], axis=1)                      # (I,N,E)
    gw = jnp.einsum('ine,ef->inf', ctx_p.astype(bf16), pow_ref[...],
                    preferred_element_type=f32) + pob_ref[...]            # (P,N,E)

    # --------- combine + ONE lane-dense store of the whole (N, P*E) block ---------
    out = gw * local                                                      # (P,N,E)
    o_ref[...] = jnp.concatenate([out[i] for i in range(P)],
                                 axis=-1).astype(o_ref.dtype)             # (N,P*E)


# ----------------------------------------------------------------------------
# Module wrapper (parameter setup + single pallas_call)
# ----------------------------------------------------------------------------
class MetaPathEncoder:
    def __init__(self, input_dim, n_heads, metapaths, key):
        assert input_dim % n_heads == 0
        self.input_dim = input_dim
        self.n_heads = n_heads
        self.metapaths = list(metapaths)
        E = input_dim
        P = len(self.metapaths)

        def init_mha(k):
            k1, k2, k3, k4 = jax.random.split(k, 4)
            bound = math.sqrt(6.0 / (2 * E))          # xavier_uniform for in_proj
            in_w = jax.random.uniform(k1, (3 * E, E), jnp.float32, -bound, bound)
            in_b = jax.random.uniform(k2, (3 * E,), jnp.float32, -0.1, 0.1)
            ob = 1.0 / math.sqrt(E)
            out_w = jax.random.uniform(k3, (E, E), jnp.float32, -ob, ob)
            out_b = jax.random.uniform(k4, (E,), jnp.float32, -0.1, 0.1)
            return in_w, in_b, out_w, out_b

        keys = jax.random.split(key, 1 + P)
        self.path_params = init_mha(keys[0])
        self.node_params = [init_mha(keys[1 + i]) for i in range(P)]

        # ---- pre-packed kernel parameters: transposed, scale folded, bf16 weights ----
        def pack(params):
            in_w, in_b, out_w, out_b = params
            dh = E // n_heads
            scale = jnp.concatenate(
                [jnp.full((E,), 1.0 / math.sqrt(dh), jnp.float32),
                 jnp.ones((2 * E,), jnp.float32)])
            w_qkv_t = (in_w.T * scale[None, :]).astype(jnp.bfloat16)     # (E, 3E)
            b_qkv = (in_b * scale).reshape(1, 3 * E)                     # (1, 3E) f32
            return (w_qkv_t, b_qkv,
                    out_w.T.astype(jnp.bfloat16), out_b.reshape(1, E))

        self.pw_t, self.pb, self.pow_t, self.pob = pack(self.path_params)
        packed = [pack(p) for p in self.node_params]
        self.nw_t = jnp.stack([p[0] for p in packed])                    # (P, E, 3E)
        self.nb = jnp.stack([p[1] for p in packed])                      # (P, 1, 3E)
        self.now_t = jnp.stack([p[2] for p in packed])                   # (P, E, E)
        self.nob = jnp.stack([p[3] for p in packed])                     # (P, 1, E)

    def __call__(self, emb_dict):
        E, H = self.input_dim, self.n_heads
        P = len(self.metapaths)

        # _encode_path: identity lookup (see TODO at top of file).
        all_paths = jnp.stack([emb_dict[mp] for mp in self.metapaths], axis=0)  # (P, N, E)
        _, N, _ = all_paths.shape
        x = all_paths.astype(jnp.bfloat16)

        def spec(shape):
            n = len(shape)
            return pl.BlockSpec(shape, lambda i, _n=n: (0,) * _n)

        # NOTE(scale-up): for large N, replace grid=(1,) with a grid over N
        # ("parallel" for v7x's 2 TCs) and set vmem_limit_bytes for its 64 MiB.
        return pl.pallas_call(
            functools.partial(_metapath_fused_kernel, H, P, E),
            out_shape=jax.ShapeDtypeStruct((N, P * E), jnp.float32),
            grid=(1,),
            in_specs=[
                spec((P, N, E)),        # stacked metapath embeddings
                spec((E, 3 * E)),       # path W_qkv^T (q-scaled)
                spec((1, 3 * E)),       # path b_qkv  (q-scaled)
                spec((E, E)),           # path W_out^T
                spec((1, E)),           # path b_out
                spec((P, E, 3 * E)),    # node W_qkv^T (stacked, q-scaled)
                spec((P, 1, 3 * E)),    # node b_qkv
                spec((P, E, E)),        # node W_out^T
                spec((P, 1, E)),        # node b_out
            ],
            out_specs=spec((N, P * E)),
            compiler_params=pltpu.CompilerParams(
                dimension_semantics=("arbitrary",)),
        )(x, self.pw_t, self.pb, self.pow_t, self.pob,
          self.nw_t, self.nb, self.now_t, self.nob)


# ----------------------------------------------------------------------------
# Pure-JAX references.
#   reference_forward        : exact mirror of torch.nn.MultiheadAttention (f32).
#   packed_reference_forward : same math on the packed bf16-rounded operands the
#                              kernel uses -> tight check isolating layout bugs
#                              from bf16 rounding.
# ----------------------------------------------------------------------------
def _mha_ref(x, in_w, in_b, out_w, out_b, n_heads):
    unbatched = x.ndim == 2
    xs = x[:, None, :] if unbatched else x           # (L, N, E)
    L, N, E = xs.shape
    dh = E // n_heads
    q = xs @ in_w[:E].T + in_b[:E]
    k = xs @ in_w[E:2 * E].T + in_b[E:2 * E]
    v = xs @ in_w[2 * E:].T + in_b[2 * E:]
    split = lambda t: t.reshape(L, N * n_heads, dh).transpose(1, 0, 2)
    qh, kh, vh = split(q), split(k), split(v)
    s = jnp.einsum('bld,bmd->blm', qh * (dh ** -0.5), kh)
    p = jax.nn.softmax(s, axis=-1)
    ctx = jnp.einsum('blm,bmd->bld', p, vh).transpose(1, 0, 2).reshape(L, N, E)
    out = ctx @ out_w.T + out_b
    return out[:, 0, :] if unbatched else out


def reference_forward(enc, emb_dict):
    all_paths = jnp.stack([emb_dict[mp] for mp in enc.metapaths], axis=0)   # (P, N, E)
    gw = _mha_ref(all_paths, *enc.path_params, enc.n_heads)                 # (P, N, E)
    outs = []
    for i, _ in enumerate(enc.metapaths):
        local = _mha_ref(all_paths[i], *enc.node_params[i], enc.n_heads)    # (N, E)
        outs.append(gw[i] * local)
    return jnp.concatenate(outs, axis=-1)


def _packed_mha_ref(x, w_qkv_t, b_qkv, w_out_t, b_out, n_heads):
    """Batch-first MHA on the packed (pre-transposed, q-pre-scaled) parameters."""
    E = w_out_t.shape[0]
    dh = E // n_heads
    qkv = x @ w_qkv_t + b_qkv                       # (B, L, 3E)
    parts = []
    for h in range(n_heads):
        qh = qkv[..., h * dh:(h + 1) * dh]
        kh = qkv[..., E + h * dh:E + (h + 1) * dh]
        vh = qkv[..., 2 * E + h * dh:2 * E + (h + 1) * dh]
        p = jax.nn.softmax(jnp.einsum('bld,bmd->blm', qh, kh), axis=-1)
        parts.append(jnp.einsum('blm,bmd->bld', p, vh))
    return jnp.concatenate(parts, axis=-1) @ w_out_t + b_out


def packed_reference_forward(enc, emb_dict):
    P, H = len(enc.metapaths), enc.n_heads
    f32 = jnp.float32
    x = jnp.stack([emb_dict[mp] for mp in enc.metapaths], axis=0)
    x = x.astype(jnp.bfloat16).astype(f32)                    # kernel input rounding
    gw = _packed_mha_ref(jnp.transpose(x, (1, 0, 2)),
                         enc.pw_t.astype(f32), enc.pb,
                         enc.pow_t.astype(f32), enc.pob, H)   # (N, P, E)
    outs = []
    for i in range(P):
        local = _packed_mha_ref(x[i][None],
                                enc.nw_t[i].astype(f32), enc.nb[i],
                                enc.now_t[i].astype(f32), enc.nob[i], H)[0]
        outs.append(gw[:, i, :] * local)
    return jnp.concatenate(outs, axis=-1)


if __name__ == "__main__":
    INPUT_DIM = 32
    N_HEADS = 4
    METAPATHS = ("APA", "APCPA", "APTPA")
    N_NODES = 8

    key = jax.random.PRNGKey(0)
    k_params, k_data = jax.random.split(key)
    enc = MetaPathEncoder(INPUT_DIM, N_HEADS, METAPATHS, k_params)

    data_keys = jax.random.split(k_data, len(METAPATHS))
    emb_dict = {mp: jax.random.normal(dk, (N_NODES, INPUT_DIM), jnp.float32)
                for mp, dk in zip(METAPATHS, data_keys)}

    out = jax.block_until_ready(enc(emb_dict))
    assert out.shape == (N_NODES, len(METAPATHS) * INPUT_DIM), out.shape

    # Tight check: reference built from the same bf16-rounded operands as the
    # kernel -> isolates layout/indexing bugs from precision.
    ref_packed = packed_reference_forward(enc, emb_dict)
    err_p = float(jnp.max(jnp.abs(out - ref_packed)))
    assert jnp.allclose(out, ref_packed, atol=4e-2, rtol=4e-2), \
        f"packed-ref max abs err {err_p}"

    # Loose end-to-end check vs the pure-f32 torch-equivalent reference
    # (covers the bf16-operand rounding budget).
    ref_f32 = reference_forward(enc, emb_dict)
    err_f = float(jnp.max(jnp.abs(out - ref_f32)))
    assert jnp.allclose(out, ref_f32, atol=1.5e-1, rtol=1.5e-1), \
        f"f32-ref max abs err {err_f}"

    print("KERNEL_OK")
</pallas_src>

<mosaic_0001>
module attributes {stable_mosaic.version = 11 : i64} {
  func.func @_metapath_fused_kernel(%arg0: i32, %arg1: memref<3x8x32xbf16, #tpu.memory_space<vmem>>, %arg2: memref<32x96xbf16, #tpu.memory_space<vmem>>, %arg3: memref<1x96xf32, #tpu.memory_space<vmem>>, %arg4: memref<32x32xbf16, #tpu.memory_space<vmem>>, %arg5: memref<1x32xf32, #tpu.memory_space<vmem>>, %arg6: memref<3x32x96xbf16, #tpu.memory_space<vmem>>, %arg7: memref<3x1x96xf32, #tpu.memory_space<vmem>>, %arg8: memref<3x32x32xbf16, #tpu.memory_space<vmem>>, %arg9: memref<3x1x32xf32, #tpu.memory_space<vmem>>, %arg10: memref<8x96xf32, #tpu.memory_space<vmem>>) attributes {dimension_semantics = [#tpu.dimension_semantics<arbitrary>], iteration_bounds = array<i64: 1>, scalar_prefetch = 0 : i64, scratch_operands = 0 : i64, tpu.core_type = #tpu.core_type<tc>, window_params = [{pipeline_mode = #tpu.pipeline_mode<synchronous>, transform_indices = @transform_0, window_bounds = array<i64: 3, 8, 32>}, {pipeline_mode = #tpu.pipeline_mode<synchronous>, transform_indices = @transform_1, window_bounds = array<i64: 32, 96>}, {pipeline_mode = #tpu.pipeline_mode<synchronous>, transform_indices = @transform_2, window_bounds = array<i64: 1, 96>}, {pipeline_mode = #tpu.pipeline_mode<synchronous>, transform_indices = @transform_3, window_bounds = array<i64: 32, 32>}, {pipeline_mode = #tpu.pipeline_mode<synchronous>, transform_indices = @transform_4, window_bounds = array<i64: 1, 32>}, {pipeline_mode = #tpu.pipeline_mode<synchronous>, transform_indices = @transform_5, window_bounds = array<i64: 3, 32, 96>}, {pipeline_mode = #tpu.pipeline_mode<synchronous>, transform_indices = @transform_6, window_bounds = array<i64: 3, 1, 96>}, {pipeline_mode = #tpu.pipeline_mode<synchronous>, transform_indices = @transform_7, window_bounds = array<i64: 3, 32, 32>}, {pipeline_mode = #tpu.pipeline_mode<synchronous>, transform_indices = @transform_8, window_bounds = array<i64: 3, 1, 32>}, {pipeline_mode = #tpu.pipeline_mode<synchronous>, transform_indices = @transform_9, window_bounds = array<i64: 8, 96>}]} {
    %c0 = arith.constant 0 : index
    %c0_0 = arith.constant 0 : index
    %c0_1 = arith.constant 0 : index
    %0 = vector.load %arg1[%c0, %c0_0, %c0_1] : memref<3x8x32xbf16, #tpu.memory_space<vmem>>, vector<3x8x32xbf16>
    %1 = tpu.iota {dimensions = array<i32: 0>} : vector<32x4xi32>
    %2 = tpu.iota {dimensions = array<i32: 1>} : vector<32x4xi32>
    %c8_i32 = arith.constant 8 : i32
    %3 = vector.broadcast %c8_i32 : i32 to vector<32x4xi32>
    %4 = arith.muli %2, %3 : vector<32x4xi32>
    %5 = arith.cmpi sge, %1, %4 : vector<32x4xi32>
    %c1_i32 = arith.constant 1 : i32
    %6 = vector.broadcast %c1_i32 : i32 to vector<32x4xi32>
    %7 = arith.addi %2, %6 : vector<32x4xi32>
    %c8_i32_2 = arith.constant 8 : i32
    %8 = vector.broadcast %c8_i32_2 : i32 to vector<32x4xi32>
    %9 = arith.muli %7, %8 : vector<32x4xi32>
    %10 = arith.cmpi slt, %1, %9 : vector<32x4xi32>
    %11 = arith.andi %5, %10 : vector<32x4xi1>
    %12 = arith.extui %11 : vector<32x4xi1> to vector<32x4xi32>
    %13 = arith.sitofp %12 : vector<32x4xi32> to vector<32x4xf32>
    %14 = tpu.iota {dimensions = array<i32: 0>} : vector<4x32xi32>
    %15 = tpu.iota {dimensions = array<i32: 1>} : vector<4x32xi32>
    %c8_i32_3 = arith.constant 8 : i32
    %16 = vector.broadcast %c8_i32_3 : i32 to vector<4x32xi32>
    %17 = arith.muli %14, %16 : vector<4x32xi32>
    %18 = arith.cmpi sge, %15, %17 : vector<4x32xi32>
    %c1_i32_4 = arith.constant 1 : i32
    %19 = vector.broadcast %c1_i32_4 : i32 to vector<4x32xi32>
    %20 = arith.addi %14, %19 : vector<4x32xi32>
    %c8_i32_5 = arith.constant 8 : i32
    %21 = vector.broadcast %c8_i32_5 : i32 to vector<4x32xi32>
    %22 = arith.muli %20, %21 : vector<4x32xi32>
    %23 = arith.cmpi slt, %15, %22 : vector<4x32xi32>
    %24 = arith.andi %18, %23 : vector<4x32xi1>
    %25 = arith.extui %24 : vector<4x32xi1> to vector<4x32xi32>
    %26 = arith.sitofp %25 : vector<4x32xi32> to vector<4x32xf32>
    %c0_6 = arith.constant 0 : index
    %c0_7 = arith.constant 0 : index
    %c0_8 = arith.constant 0 : index
    %27 = vector.load %arg6[%c0_6, %c0_7, %c0_8] : memref<3x32x96xbf16, #tpu.memory_space<vmem>>, vector<3x32x96xbf16>
    "tpu.trace_start"() <{level = 10 : i32, message = "pne,pef->pnf"}> : () -> ()
    %cst = arith.constant dense<0.000000e+00> : vector<3x8x96xf32>
    %28 = tpu.matmul %0, %27, %cst {dimension_numbers = #tpu.dot_dimension_numbers<[2], [1], [1], [2], [0, 0, 0, 1, 1, 2], [0], [0]>} : vector<3x8x32xbf16>, vector<3x32x96xbf16>, vector<3x8x96xf32> -> vector<3x8x96xf32>
    "tpu.trace_stop"() : () -> ()
    %c0_9 = arith.constant 0 : index
    %c0_10 = arith.constant 0 : index
    %c0_11 = arith.constant 0 : index
    %29 = vector.load %arg7[%c0_9, %c0_10, %c0_11] : memref<3x1x96xf32, #tpu.memory_space<vmem>>, vector<3x1x96xf32>
    %30 = vector.broadcast %29 : vector<3x1x96xf32> to vector<3x8x96xf32>
    %31 = arith.addf %28, %30 : vector<3x8x96xf32>
    %32 = vector.extract_strided_slice %31 {offsets = [0, 0, 0], sizes = [3, 8, 32], strides = [1, 1, 1]} : vector<3x8x96xf32> to vector<3x8x32xf32>
    %33 = vector.extract_strided_slice %31 {offsets = [0, 0, 32], sizes = [3, 8, 32], strides = [1, 1, 1]} : vector<3x8x96xf32> to vector<3x8x32xf32>
    %34 = vector.extract_strided_slice %31 {offsets = [0, 0, 64], sizes = [3, 8, 32], strides = [1, 1, 1]} : vector<3x8x96xf32> to vector<3x8x32xf32>
    %35 = vector.shape_cast %32 : vector<3x8x32xf32> to vector<3x8x1x32xf32>
    %36 = vector.shape_cast %33 : vector<3x8x32xf32> to vector<3x1x8x32xf32>
    %37 = vector.broadcast %35 : vector<3x8x1x32xf32> to vector<3x8x8x32xf32>
    %38 = vector.broadcast %36 : vector<3x1x8x32xf32> to vector<3x8x8x32xf32>
    %39 = arith.mulf %37, %38 : vector<3x8x8x32xf32>
    %40 = vector.shape_cast %39 : vector<3x8x8x32xf32> to vector<192x32xf32>
    %cst_12 = arith.constant dense<0.000000e+00> : vector<192x4xf32>
    %41 = tpu.matmul %40, %13, %cst_12 {dimension_numbers = #tpu.dot_dimension_numbers<[1], [0], [0], [1], [0, 0, 1, 1], [], []>} : vector<192x32xf32>, vector<32x4xf32>, vector<192x4xf32> -> vector<192x4xf32>
    %42 = vector.shape_cast %41 : vector<192x4xf32> to vector<3x8x8x4xf32>
    %cst_13 = arith.constant dense<0xFF800000> : vector<3x8x4xf32>
    %43 = vector.multi_reduction <maximumf>, %42, %cst_13 [2] : vector<3x8x8x4xf32> to vector<3x8x4xf32>
    %44 = vector.shape_cast %43 : vector<3x8x4xf32> to vector<3x8x1x4xf32>
    %45 = vector.broadcast %44 : vector<3x8x1x4xf32> to vector<3x8x8x4xf32>
    %46 = arith.subf %42, %45 : vector<3x8x8x4xf32>
    %47 = math.exp %46 : vector<3x8x8x4xf32>
    %cst_14 = arith.constant dense<0.000000e+00> : vector<3x8x4xf32>
    %48 = vector.multi_reduction <add>, %47, %cst_14 [2] : vector<3x8x8x4xf32> to vector<3x8x4xf32>
    %49 = vector.shape_cast %48 : vector<3x8x4xf32> to vector<3x8x1x4xf32>
    %50 = vector.broadcast %49 : vector<3x8x1x4xf32> to vector<3x8x8x4xf32>
    %51 = arith.divf %47, %50 : vector<3x8x8x4xf32>
    %52 = vector.shape_cast %51 : vector<3x8x8x4xf32> to vector<192x4xf32>
    %cst_15 = arith.constant dense<0.000000e+00> : vector<192x32xf32>
    %53 = tpu.matmul %52, %26, %cst_15 {dimension_numbers = #tpu.dot_dimension_numbers<[1], [0], [0], [1], [0, 0, 1, 1], [], []>} : vector<192x4xf32>, vector<4x32xf32>, vector<192x32xf32> -> vector<192x32xf32>
    %54 = vector.shape_cast %53 : vector<192x32xf32> to vector<3x8x8x32xf32>
    %55 = vector.shape_cast %34 : vector<3x8x32xf32> to vector<3x1x8x32xf32>
    %56 = vector.broadcast %55 : vector<3x1x8x32xf32> to vector<3x8x8x32xf32>
    %57 = arith.mulf %54, %56 : vector<3x8x8x32xf32>
    %cst_16 = arith.constant dense<0.000000e+00> : vector<3x8x32xf32>
    %58 = vector.multi_reduction <add>, %57, %cst_16 [2] : vector<3x8x8x32xf32> to vector<3x8x32xf32>
    %59 = arith.truncf %58 : vector<3x8x32xf32> to vector<3x8x32xbf16>
    %c0_17 = arith.constant 0 : index
    %c0_18 = arith.constant 0 : index
    %c0_19 = arith.constant 0 : index
    %60 = vector.load %arg8[%c0_17, %c0_18, %c0_19] : memref<3x32x32xbf16, #tpu.memory_space<vmem>>, vector<3x32x32xbf16>
    "tpu.trace_start"() <{level = 10 : i32, message = "pne,pef->pnf"}> : () -> ()
    %cst_20 = arith.constant dense<0.000000e+00> : vector<3x8x32xf32>
    %61 = tpu.matmul %59, %60, %cst_20 {dimension_numbers = #tpu.dot_dimension_numbers<[2], [1], [1], [2], [0, 0, 0, 1, 1, 2], [0], [0]>} : vector<3x8x32xbf16>, vector<3x32x32xbf16>, vector<3x8x32xf32> -> vector<3x8x32xf32>
    "tpu.trace_stop"() : () -> ()
    %c0_21 = arith.constant 0 : index
    %c0_22 = arith.constant 0 : index
    %c0_23 = arith.constant 0 : index
    %62 = vector.load %arg9[%c0_21, %c0_22, %c0_23] : memref<3x1x32xf32, #tpu.memory_space<vmem>>, vector<3x1x32xf32>
    %63 = vector.broadcast %62 : vector<3x1x32xf32> to vector<3x8x32xf32>
    %64 = arith.addf %61, %63 : vector<3x8x32xf32>
    %c0_24 = arith.constant 0 : index
    %c0_25 = arith.constant 0 : index
    %65 = vector.load %arg2[%c0_24, %c0_25] : memref<32x96xbf16, #tpu.memory_space<vmem>>, vector<32x96xbf16>
    "tpu.trace_start"() <{level = 10 : i32, message = "pne,ef->pnf"}> : () -> ()
    %cst_26 = arith.constant dense<0.000000e+00> : vector<3x8x96xf32>
    %66 = tpu.matmul %0, %65, %cst_26 {dimension_numbers = #tpu.dot_dimension_numbers<[2], [0], [0, 1], [1], [0, 0, 0, 1, 1, 1], [], []>} : vector<3x8x32xbf16>, vector<32x96xbf16>, vector<3x8x96xf32> -> vector<3x8x96xf32>
    "tpu.trace_stop"() : () -> ()
    %c0_27 = arith.constant 0 : index
    %c0_28 = arith.constant 0 : index
    %67 = vector.load %arg3[%c0_27, %c0_28] : memref<1x96xf32, #tpu.memory_space<vmem>>, vector<1x96xf32>
    %68 = vector.shape_cast %67 : vector<1x96xf32> to vector<1x1x96xf32>
    %69 = vector.broadcast %68 : vector<1x1x96xf32> to vector<3x8x96xf32>
    %70 = arith.addf %66, %69 : vector<3x8x96xf32>
    %71 = vector.extract_strided_slice %70 {offsets = [0, 0, 0], sizes = [3, 8, 32], strides = [1, 1, 1]} : vector<3x8x96xf32> to vector<3x8x32xf32>
    %72 = vector.extract_strided_slice %70 {offsets = [0, 0, 32], sizes = [3, 8, 32], strides = [1, 1, 1]} : vector<3x8x96xf32> to vector<3x8x32xf32>
    %73 = vector.extract_strided_slice %70 {offsets = [0, 0, 64], sizes = [3, 8, 32], strides = [1, 1, 1]} : vector<3x8x96xf32> to vector<3x8x32xf32>
    %74 = vector.shape_cast %71 : vector<3x8x32xf32> to vector<3x1x8x32xf32>
    %75 = vector.shape_cast %72 : vector<3x8x32xf32> to vector<1x3x8x32xf32>
    %76 = vector.broadcast %74 : vector<3x1x8x32xf32> to vector<3x3x8x32xf32>
    %77 = vector.broadcast %75 : vector<1x3x8x32xf32> to vector<3x3x8x32xf32>
    %78 = arith.mulf %76, %77 : vector<3x3x8x32xf32>
    %79 = vector.shape_cast %78 : vector<3x3x8x32xf32> to vector<72x32xf32>
    %cst_29 = arith.constant dense<0.000000e+00> : vector<72x4xf32>
    %80 = tpu.matmul %79, %13, %cst_29 {dimension_numbers = #tpu.dot_dimension_numbers<[1], [0], [0], [1], [0, 0, 1, 1], [], []>} : vector<72x32xf32>, vector<32x4xf32>, vector<72x4xf32> -> vector<72x4xf32>
    %81 = vector.shape_cast %80 : vector<72x4xf32> to vector<3x3x8x4xf32>
    %cst_30 = arith.constant dense<0xFF800000> : vector<3x8x4xf32>
    %82 = vector.multi_reduction <maximumf>, %81, %cst_30 [1] : vector<3x3x8x4xf32> to vector<3x8x4xf32>
    %83 = vector.shape_cast %82 : vector<3x8x4xf32> to vector<3x1x8x4xf32>
    %84 = vector.broadcast %83 : vector<3x1x8x4xf32> to vector<3x3x8x4xf32>
    %85 = arith.subf %81, %84 : vector<3x3x8x4xf32>
    %86 = math.exp %85 : vector<3x3x8x4xf32>
    %cst_31 = arith.constant dense<0.000000e+00> : vector<3x8x4xf32>
    %87 = vector.multi_reduction <add>, %86, %cst_31 [1] : vector<3x3x8x4xf32> to vector<3x8x4xf32>
    %88 = vector.shape_cast %87 : vector<3x8x4xf32> to vector<3x1x8x4xf32>
    %89 = vector.broadcast %88 : vector<3x1x8x4xf32> to vector<3x3x8x4xf32>
    %90 = arith.divf %86, %89 : vector<3x3x8x4xf32>
    %91 = vector.shape_cast %90 : vector<3x3x8x4xf32> to vector<72x4xf32>
    %cst_32 = arith.constant dense<0.000000e+00> : vector<72x32xf32>
    %92 = tpu.matmul %91, %26, %cst_32 {dimension_numbers = #tpu.dot_dimension_numbers<[1], [0], [0], [1], [0, 0, 1, 1], [], []>} : vector<72x4xf32>, vector<4x32xf32>, vector<72x32xf32> -> vector<72x32xf32>
    %93 = vector.shape_cast %92 : vector<72x32xf32> to vector<3x3x8x32xf32>
    %94 = vector.shape_cast %73 : vector<3x8x32xf32> to vector<1x3x8x32xf32>
    %95 = vector.broadcast %94 : vector<1x3x8x32xf32> to vector<3x3x8x32xf32>
    %96 = arith.mulf %93, %95 : vector<3x3x8x32xf32>
    %cst_33 = arith.constant dense<0.000000e+00> : vector<3x8x32xf32>
    %97 = vector.multi_reduction <add>, %96, %cst_33 [1] : vector<3x3x8x32xf32> to vector<3x8x32xf32>
    %98 = arith.truncf %97 : vector<3x8x32xf32> to vector<3x8x32xbf16>
    %c0_34 = arith.constant 0 : index
    %c0_35 = arith.constant 0 : index
    %99 = vector.load %arg4[%c0_34, %c0_35] : memref<32x32xbf16, #tpu.memory_space<vmem>>, vector<32x32xbf16>
    "tpu.trace_start"() <{level = 10 : i32, message = "ine,ef->inf"}> : () -> ()
    %cst_36 = arith.constant dense<0.000000e+00> : vector<3x8x32xf32>
    %100 = tpu.matmul %98, %99, %cst_36 {dimension_numbers = #tpu.dot_dimension_numbers<[2], [0], [0, 1], [1], [0, 0, 0, 1, 1, 1], [], []>} : vector<3x8x32xbf16>, vector<32x32xbf16>, vector<3x8x32xf32> -> vector<3x8x32xf32>
    "tpu.trace_stop"() : () -> ()
    %c0_37 = arith.constant 0 : index
    %c0_38 = arith.constant 0 : index
    %101 = vector.load %arg5[%c0_37, %c0_38] : memref<1x32xf32, #tpu.memory_space<vmem>>, vector<1x32xf32>
    %102 = vector.shape_cast %101 : vector<1x32xf32> to vector<1x1x32xf32>
    %103 = vector.broadcast %102 : vector<1x1x32xf32> to vector<3x8x32xf32>
    %104 = arith.addf %100, %103 : vector<3x8x32xf32>
    %105 = arith.mulf %104, %64 : vector<3x8x32xf32>
    %106 = vector.extract_strided_slice %105 {offsets = [0, 0, 0], sizes = [1, 8, 32], strides = [1, 1, 1]} : vector<3x8x32xf32> to vector<1x8x32xf32>
    %107 = vector.shape_cast %106 : vector<1x8x32xf32> to vector<8x32xf32>
    %108 = vector.extract_strided_slice %105 {offsets = [1, 0, 0], sizes = [1, 8, 32], strides = [1, 1, 1]} : vector<3x8x32xf32> to vector<1x8x32xf32>
    %109 = vector.shape_cast %108 : vector<1x8x32xf32> to vector<8x32xf32>
    %110 = vector.extract_strided_slice %105 {offsets = [2, 0, 0], sizes = [1, 8, 32], strides = [1, 1, 1]} : vector<3x8x32xf32> to vector<1x8x32xf32>
    %111 = vector.shape_cast %110 : vector<1x8x32xf32> to vector<8x32xf32>
    %112 = tpu.concatenate %107, %109, %111 in 1 : vector<8x32xf32>, vector<8x32xf32>, vector<8x32xf32> -> vector<8x96xf32>
    %c0_39 = arith.constant 0 : index
    %c0_40 = arith.constant 0 : index
    %113 = vector.load %arg10[%c0_39, %c0_40] : memref<8x96xf32, #tpu.memory_space<vmem>>, vector<8x96xf32>
    tpu.vector_store %arg10[%c0_39, %c0_40], %112 {strides = array<i32>} : memref<8x96xf32, #tpu.memory_space<vmem>>, vector<8x96xf32>,
    return
  }
  func.func @transform_0(%arg0: i32) -> (i32, i32, i32) {
    %c0_i32 = arith.constant 0 : i32
    %c0_i32_0 = arith.constant 0 : i32
    %c0_i32_1 = arith.constant 0 : i32
    %c0_i32_2 = arith.constant 0 : i32
    return %c0_i32, %c0_i32_0, %c0_i32_1 : i32, i32, i32
  }
  func.func @transform_1(%arg0: i32) -> (i32, i32) {
    %c0_i32 = arith.constant 0 : i32
    %c0_i32_0 = arith.constant 0 : i32
    %c0_i32_1 = arith.constant 0 : i32
    return %c0_i32, %c0_i32_0 : i32, i32
  }
  func.func @transform_2(%arg0: i32) -> (i32, i32) {
    %c0_i32 = arith.constant 0 : i32
    %c0_i32_0 = arith.constant 0 : i32
    %c0_i32_1 = arith.constant 0 : i32
    return %c0_i32, %c0_i32_0 : i32, i32
  }
  func.func @transform_3(%arg0: i32) -> (i32, i32) {
    %c0_i32 = arith.constant 0 : i32
    %c0_i32_0 = arith.constant 0 : i32
    %c0_i32_1 = arith.constant 0 : i32
    return %c0_i32, %c0_i32_0 : i32, i32
  }
  func.func @transform_4(%arg0: i32) -> (i32, i32) {
    %c0_i32 = arith.constant 0 : i32
    %c0_i32_0 = arith.constant 0 : i32
    %c0_i32_1 = arith.constant 0 : i32
    return %c0_i32, %c0_i32_0 : i32, i32
  }
  func.func @transform_5(%arg0: i32) -> (i32, i32, i32) {
    %c0_i32 = arith.constant 0 : i32
    %c0_i32_0 = arith.constant 0 : i32
    %c0_i32_1 = arith.constant 0 : i32
    %c0_i32_2 = arith.constant 0 : i32
    return %c0_i32, %c0_i32_0, %c0_i32_1 : i32, i32, i32
  }
  func.func @transform_6(%arg0: i32) -> (i32, i32, i32) {
    %c0_i32 = arith.constant 0 : i32
    %c0_i32_0 = arith.constant 0 : i32
    %c0_i32_1 = arith.constant 0 : i32
    %c0_i32_2 = arith.constant 0 : i32
    return %c0_i32, %c0_i32_0, %c0_i32_1 : i32, i32, i32
  }
  func.func @transform_7(%arg0: i32) -> (i32, i32, i32) {
    %c0_i32 = arith.constant 0 : i32
    %c0_i32_0 = arith.constant 0 : i32
    %c0_i32_1 = arith.constant 0 : i32
    %c0_i32_2 = arith.constant 0 : i32
    return %c0_i32, %c0_i32_0, %c0_i32_1 : i32, i32, i32
  }
  func.func @transform_8(%arg0: i32) -> (i32, i32, i32) {
    %c0_i32 = arith.constant 0 : i32
    %c0_i32_0 = arith.constant 0 : i32
    %c0_i32_1 = arith.constant 0 : i32
    %c0_i32_2 = arith.constant 0 : i32
    return %c0_i32, %c0_i32_0, %c0_i32_1 : i32, i32, i32
  }
  func.func @transform_9(%arg0: i32) -> (i32, i32) {
    %c0_i32 = arith.constant 0 : i32
    %c0_i32_0 = arith.constant 0 : i32
    %c0_i32_1 = arith.constant 0 : i32
    return %c0_i32, %c0_i32_0 : i32, i32
  }
}

</mosaic_0001>

<bundles_post_ra>
// kernel: tpu_custom_call.1
= control target key start
LH: loop header
LB: loop body
LE: loop exit
PB: predicated region body
PF: predicated region fallthrough
CT: control target
= control target key end

     0   :  { %14 = vsyncpa [#allocation3], 0  ;;  %s4268_s0 = inlined_call_operand.hbm [shape: bf16[3,8,32], index: 0, kind: input, shape index: {}]   ;;  %s4269_s1 = inlined_call_operand.hbm [shape: bf16[32,96], index: 1, kind: input, shape index: {}]   ;;  %s4270_s2 = inlined_call_operand.vmem [shape: f32[1,96], index: 2, kind: input, shape index: {}]   ;;  %s4271_s3 = inlined_call_operand.hbm [shape: bf16[32,32], index: 3, kind: input, shape index: {}]   ;;  %s4272_s4 = inlined_call_operand.hbm [shape: f32[1,32], index: 4, kind: input, shape index: {}]   ;;  %s4273_s5 = inlined_call_operand.hbm [shape: bf16[3,32,96], index: 5, kind: input, shape index: {}]   ;;  %s4274_s6 = inlined_call_operand.vmem [shape: f32[3,1,96], index: 6, kind: input, shape index: {}]   ;;  %s4275_s7 = inlined_call_operand.hbm [shape: bf16[3,32,32], index: 7, kind: input, shape index: {}]   ;;  %s4276_s8 = inlined_call_operand.vmem [shape: f32[3,1,32], index: 8, kind: input, shape index: {}]   ;;  %s4277_s9 = inlined_call_operand.hbm [shape: f32[8,96], index: 9, kind: output, shape index: {}]  }
   0x1   :  { %15 = vsyncpa [#allocation6], 0 }
   0x2   :  { %16 = vsyncpa [#allocation9], 0 }
   0x3   :  { %17 = vsyncpa [#allocation12], 0 }
   0x4   :  { %18 = vsyncpa [#allocation4], 0  ;;  %s3475_s30 = smov [#allocation5]   ;;  %s3476_s11 = smov [#allocation8]  }
   0x5   :  { %s36_s10 = sshll.u32 %s3475_s30, 4  ;;  %s63_s12 = sshll.u32 %s3476_s11, 4  ;;  %s37_s10 = int_to_ptr.vmem [resolvable:$true] %s36_s10  ;;  %s64_s12 = int_to_ptr.vmem [resolvable:$true] %s63_s12 }
   0x6   :  { %s3333_s13 = scalar_lea.vmem %s37_s10, 256  ;;  %p3338_p1 = scmp.lt.s32.totalorder %s37_s10, %s37_s10 }
   0x7   :  { %p3334_p0 = scmp.ne.s32.totalorder %s37_s10, %s3333_s13  ;;  %p3339_p2 = scmp.lt.s32.totalorder %s3333_s13, %s3333_s13 }
   0x9   :  { %p3340_p3 = por %p3339_p2, %p3338_p1 }
   0xb   :  { %p3341_p4 = pnand %p3340_p3, %p3334_p0 }
   0xd   :  { %3344 = shalt.err (!%p3341_p4)
}
   0xe   :  { %s3477_s14 = smov 64   ;;  %s3478_s15 = smov 4  }
   0xf   :  { %42 = dma.hbm_to_vmem [thread:$0]  %s4269_s1, 256, %s37_s10, [#allocation6], %s3477_s14, %s3477_s14, %s3478_s15  }
  0x10   :  { %s3353_s18 = scalar_lea.vmem %s64_s12, 16  ;;  %s3357_s19 = scalar_lea.vmem %s64_s12, 32 }
  0x11   :  { %p3354_p5 = scmp.ne.s32.totalorder %s64_s12, %s3353_s18  ;;  %p3358_p6 = scmp.lt.s32.totalorder %s64_s12, %s64_s12 }
  0x12   :  { %p3359_p7 = scmp.lt.s32.totalorder %s3357_s19, %s3353_s18 }
  0x14   :  { %p3360_p8 = por %p3359_p7, %p3358_p6 }
  0x16   :  { %p3361_p9 = pnand %p3360_p8, %p3354_p5 }
  0x18   :  { %3364 = shalt.err (!%p3361_p9)
}
  0x19   :  { %66 = dma.hbm_to_vmem [thread:$0]  %s4272_s4, 16, %s64_s12, [#allocation9]  }
  0x1a   :  { %s3479_s22 = smov [#allocation2]   ;;  %s3480_s24 = smov [#allocation7]  }
  0x1b   :  { %s24_s23 = sshll.u32 %s3479_s22, 4  ;;  %s50_s25 = sshll.u32 %s3480_s24, 4  ;;  %s25_s23 = int_to_ptr.vmem [resolvable:$true] %s24_s23  ;;  %s51_s25 = int_to_ptr.vmem [resolvable:$true] %s50_s25 }
  0x1c   :  { %s3373_s26 = scalar_lea.vmem %s25_s23, 192  ;;  %p3378_p11 = scmp.lt.s32.totalorder %s25_s23, %s25_s23 }
  0x1d   :  { %p3374_p10 = scmp.ne.s32.totalorder %s25_s23, %s3373_s26  ;;  %p3379_p12 = scmp.lt.s32.totalorder %s3373_s26, %s3373_s26 }
  0x1f   :  { %p3380_p13 = por %p3379_p12, %p3378_p11 }
  0x21   :  { %p3381_p0 = pnand %p3380_p13, %p3374_p10 }
  0x23   :  { %3384 = shalt.err (!%p3381_p0)
}
  0x24   :  { %30 = dma.hbm_to_vmem [thread:$0]  %s4268_s0, 192, %s25_s23, [#allocation3], %s3477_s14, %s3477_s14, %s3478_s15  }
  0x25   :  { %s3393_s4 = scalar_lea.vmem %s51_s25, 256  ;;  %p3398_p2 = scmp.lt.s32.totalorder %s51_s25, %s51_s25 }
  0x26   :  { %p3394_p1 = scmp.ne.s32.totalorder %s51_s25, %s3393_s4  ;;  %p3399_p3 = scmp.lt.s32.totalorder %s3393_s4, %s3393_s4 }
  0x28   :  { %p3400_p4 = por %p3399_p3, %p3398_p2 }
  0x2a   :  { %p3401_p5 = pnand %p3400_p4, %p3394_p1 }
  0x2c   :  { %3404 = shalt.err (!%p3401_p5)
}
  0x2d   :  { %56 = dma.hbm_to_vmem [thread:$0]  %s4271_s3, 256, %s51_s25, [#allocation6], %s3477_s14, %s3477_s14, %s3478_s15  }
  0x2e   :  { %s3481_s30 = smov [#allocation10]   ;;  %s3482_s11 = smov [#allocation11]  }
  0x2f   :  { %s72_s10 = sshll.u32 %s3481_s30, 4  ;;  %s86_s12 = sshll.u32 %s3482_s11, 4  ;;  %s73_s10 = int_to_ptr.vmem [resolvable:$true] %s72_s10  ;;  %s87_s12 = int_to_ptr.vmem [resolvable:$true] %s86_s12 }
  0x30   :  { %s3413_s0 = scalar_lea.vmem %s73_s10, 768  ;;  %p3418_p7 = scmp.lt.s32.totalorder %s73_s10, %s73_s10 }
  0x31   :  { %p3414_p6 = scmp.ne.s32.totalorder %s73_s10, %s3413_s0  ;;  %p3419_p8 = scmp.lt.s32.totalorder %s3413_s0, %s3413_s0 }
  0x33   :  { %p3420_p9 = por %p3419_p8, %p3418_p7 }
  0x35   :  { %p3421_p10 = pnand %p3420_p9, %p3414_p6 }
  0x37   :  { %3424 = shalt.err (!%p3421_p10)
}
  0x38   :  { %78 = dma.hbm_to_vmem [thread:$0]  %s4273_s5, 768, %s73_s10, [#allocation9], %s3477_s14, %s3477_s14, %s3478_s15  }
  0x39   :  { %s3433_s3 = scalar_lea.vmem %s87_s12, 768  ;;  %p3438_p12 = scmp.lt.s32.totalorder %s87_s12, %s87_s12 }
  0x3a   :  { %p3434_p11 = scmp.ne.s32.totalorder %s87_s12, %s3433_s3  ;;  %p3439_p13 = scmp.lt.s32.totalorder %s3433_s3, %s3433_s3 }
  0x3c   :  { %p3440_p0 = por %p3439_p13, %p3438_p12 }
  0x3e   :  { %p3441_p1 = pnand %p3440_p0, %p3434_p11 }
  0x40   :  { %3444 = shalt.err (!%p3441_p1)
}
  0x41   :  { %92 = dma.hbm_to_vmem [thread:$0]  %s4275_s7, 768, %s87_s12, [#allocation12], %s3477_s14, %s3477_s14, %s3478_s15  }
  0x42   :  { %3465 = dma.done.wait [#allocation3], 192  }
  0x43   :  { %3466 = vsyncadd [#allocation3], 4294967104 }
  0x44   :  { %3467 = dma.done.wait [#allocation6], 512  }
  0x45   :  { %3468 = vsyncadd [#allocation6], 4294966784 }
  0x46   :  { %3469 = dma.done.wait [#allocation9], 784  }
  0x47   :  { %3470 = vsyncadd [#allocation9], 4294966512 }
  0x48   :  { %3471 = dma.done.wait [#allocation12], 768  }
  0x49   :  { %3472 = vsyncadd [#allocation12], 4294966528  ;;  %v4280_v0 = vmov 0.0   ;;  %vm3484_vm0 = vmmov 0   ;;  %v3186_v1 = vld [vmem:[#allocation10 + $0x8] sm:$0xff]   ;;  %v3187_v2 = vld [vmem:[#allocation10] sm:$0xff]   ;;  %v117_v11 = vlaneseq }
  0x4a   :  { %2961 = vmatprep.subr.bf16.mxu0 %v4280_v0  ;;  %2969 = vmatprep.subr.bf16.mxu1 %v4280_v0  ;;  %v3188_v3 = vld [vmem:[#allocation10 + $0x18] sm:$0xff]   ;;  %v3580_v4 = vld [vmem:[#allocation2] sm:$0xf]  ;;  %vm200_vm1 = vcmask 261120   ;;  %v3191_v8 = vld [vmem:[#allocation10 + $0x28] sm:$0xff]   ;;  %v4278_v21 = vmov 1.0  }
  0x4b   :  { %2965 = vmatprep.mubr.msk.bf16.mxu0 %vm3484_vm0, %v4280_v0  ;;  %2973 = vmatprep.mubr.msk.bf16.mxu1 %vm3484_vm0, %v4280_v0  ;;  %v3189_v5 = vld [vmem:[#allocation10 + $0x10] sm:$0xff]   ;;  %v3192_v9 = vld [vmem:[#allocation10 + $0x20] sm:$0xff]   ;;  %v116_v10 = vld [vmem:[#allocation2 + $0x8] sm:$0xf]  ;;  %v3596_v12 = vshrl.u32 %v117_v11, 7  ;;  %v3599_v14 = vand.u32 127, %v117_v11 }
  0x4c   :  { %2962 = vmatpush3.bf16.msra.mxu0 %v3186_v1  ;;  %2970 = vmatpush3.bf16.msra.mxu1 %v3188_v3  ;;  %v3582_v6 = vld [vmem:[#allocation2 + $0x4] sm:$0xf]  ;;  %v4289_v24 = vmov 0  ;;  %v2743_v25 = vld [vmem:[%s4274_s6] ss:$0 sm:$0xff]  ;;  %s3486_s20 = smov 96  }
  0x4d   :  { %2963 = vmatprep.subr.bf16.mxu0 %v4280_v0  ;;  %2971 = vmatprep.subr.bf16.mxu1 %v4280_v0  ;;  %v121_v13 = vadd.s32 24, %v3596_v12  ;;  %v120_v15 = vadd.s32 16, %v3596_v12  ;;  %v124_v16 = vmul.u32 8, %v3599_v14  ;;  %v129_v17 = vadd.s32 1, %v3599_v14  ;;  %v2744_v27 = vld [vmem:[%s4274_s6 + $0x1] ss:$0 sm:$0xff] }
  0x4e   :  { %v119_v18 = vadd.s32 8, %v3596_v12  ;;  %v2745_v35 = vld [vmem:[%s4274_s6 + $0x2] ss:$0 sm:$0xff]  ;;  %v3487_v43 = vmov 1966171168   ;;  %v3674_v52 = vsub.s32 0, %v3596_v12 }
  0x4f   :  { %vm128_vm2 = vcmp.ge.s32.totalorder %v121_v13, %v124_v16  ;;  %v130_v19 = vmul.u32 8, %v129_v17  ;;  %vm127_vm3 = vcmp.ge.s32.totalorder %v120_v15, %v124_v16  ;;  %vm125_vm11 = vcmp.ge.s32.totalorder %v3596_v12, %v124_v16  ;;  %v2820_v23 = vld [vmem:[%s4270_s2] ss:$0 sm:$0xff]  ;;  %s3488_s4 = smov 32   ;;  %s3489_s28 = smov [#allocation13]  }
  0x50   :  { %2964 = vmatpush3.bf16.msra.mxu0 %v3187_v2  ;;  %2972 = vmatpush3.bf16.msra.mxu1 %v3189_v5  ;;  %vm126_vm6 = vcmp.ge.s32.totalorder %v119_v18, %v124_v16  ;;  %v359_v44 = vunpack.c.l.s4 %v3487_v43  ;;  %s2726_s29 = sshll.u32 %s3489_s28, 4  ;;  %s2727_s29 = int_to_ptr.vmem [resolvable:$true] %s2726_s29 }
  0x51   :  { %2977 = vmatprep.subr.bf16.mxu0 %v4280_v0  ;;  %vm134_vm4 = vcmp.lt.s32.totalorder %v121_v13, %v130_v19  ;;  %vm133_vm5 = vcmp.lt.s32.totalorder %v120_v15, %v130_v19  ;;  %vm132_vm7 = vcmp.lt.s32.totalorder %v119_v18, %v130_v19  ;;  %vm131_vm12 = vcmp.lt.s32.totalorder %v3596_v12, %v130_v19  ;;  %p3450_p3 = scmp.lt.s32.totalorder %s2727_s29, %s2727_s29 }
  0x52   :  { %vm3605_vm8 = vmand %vm128_vm2, %vm134_vm4  ;;  %v360_v45 = vunpack.c.0.s8 %v359_v44  ;;  %vm914_vm4 = vcmask 31744  }
  0x53   :  { %2966 = vmatmul.mubr.msk.bf16.vlgmr.msra.gmra.mxu0 %vm200_vm1, %v3580_v4  ;;  %2974 = vmatmul.mubr.msk.bf16.vlgmr.msra.gmra.mxu1 %vm200_vm1, %v3582_v6  ;;  %vm3612_vm9 = vmand %vm127_vm3, %vm133_vm5  ;;  %vm1443_vm3 = vcmask 1043456   ;;  %vm1906_vm5 = vcmask 1041409  }
  0x54   :  { %2978 = vmatpush3.bf16.msra.mxu0 %v3191_v8  ;;  %2981 = vmatprep.mubr.msk.bf16.mxu0 %vm3484_vm0, %v4280_v0  ;;  %vm3619_vm10 = vmand %vm126_vm6, %vm132_vm7  ;;  %v3668_v46 = vsub.s32 %v360_v45, %v3596_v12  ;;  %vm1908_vm6 = vcmask 1042434   ;;  %vm1910_vm7 = vcmask 1043459  }
  0x55   :  { %2979 = vmatprep.subr.bf16.mxu0 %v4280_v0  ;;  %2985 = vmatprep.subr.msk.mxu1 %vm3605_vm8, %v4278_v21  ;;  %vm3637_vm13 = vmand %vm125_vm11, %vm131_vm12  ;;  %vm1912_vm11 = vcmask 1044484   ;;  %vm1914_vm12 = vcmask 1045509  }
  0x56   :  { %2986 = vmatpush3.msk.msra.mxu1 %vm3605_vm8, %v4278_v21  ;;  %v4290_v24 = vsel %vm3637_vm13, 4294967295, %v4289_v24 }
  0x57   :  { %2987 = vmatprep.subr.msk.mxu1 %vm3612_vm9, %v4278_v21  ;;  %4291 = vst [vmem:[#allocation19_spill] sm:$0xff] %v4290_v24 }
  0x58   :  { %2980 = vmatpush3.bf16.msra.mxu0 %v3192_v9  ;;  %2988 = vmatpush3.msk.msra.mxu1 %vm3612_vm9, %v4278_v21 }
  0x59   :  { %2989 = vmatprep.subr.msk.mxu1 %vm3619_vm10, %v4278_v21 }
  0x5a   :  { %2990 = vmatpush3.msk.msra.mxu1 %vm3619_vm10, %v4278_v21 }
  0x5b   :  { %2982 = vmatmul.mubr.msk.bf16.vlgmr.msra.gmra.mxu0 %vm200_vm1, %v116_v10  ;;  %2991 = vmatprep.subr.msk.mxu1 %vm3637_vm13, %v4278_v21 }
  0x5c   :  { %2992 = vmatpush3.msk.msra.mxu1 %vm3637_vm13, %v4278_v21 }
  0x5d   :  { %3067 = vmatprep.subr.bf16.mxu1 %v4280_v0 }
 0x113   :  { %v238_v26 = vpop.f32.mrf.mxu0  ;;  %v293_v30 = vpop.f32.mrf.mxu1 }
 0x114   :  { %v239_v28 = vadd.f32 %v2743_v25, %v238_v26  ;;  %v294_v31 = vadd.f32 %v2744_v27, %v293_v30 }
 0x115   :  { %v2967_v29 = vpop.f32.mrf.mxu0  ;;  %v2975_v33 = vpop.f32.mrf.mxu1 }
 0x116   :  { %624 = vrot.lane.b32.xlu0 %v239_v28, %s3486_s20  ;;  %v364_v47 = vrot.slane %v239_v28, %v3668_v46  ;;  %v357_v49 = vcombine.high %v239_v28, %v239_v28  ;;  %v413_v2 = vrot.slane %v294_v31, %v3668_v46  ;;  %v406_v13 = vcombine.high %v294_v31, %v294_v31 }
 0x117   :  { %v241_v32 = vpop.f32.mrf.mxu0  ;;  %v296_v36 = vpop.f32.mrf.mxu1 }
 0x118   :  { %v372_v48 = vcombine.high %v364_v47, %v364_v47  ;;  %v380_v50 = vrot.slane %v364_v47, %v3668_v46  ;;  %v371_v53 = vrot.slane %v357_v49, %v3668_v46  ;;  %v421_v15 = vcombine.high %v413_v2, %v413_v2 }
 0x119   :  { %v2968_v34 = vpop.f32.mrf.mxu0  ;;  %v2976_v38 = vpop.f32.mrf.mxu1  ;;  %v429_v18 = vrot.slane %v413_v2, %v3668_v46  ;;  %v420_v27 = vrot.slane %v406_v13, %v3668_v46 }
 0x11a   :  { %626 = vrot.lane.b32.xlu0 %v294_v31, %s3486_s20  ;;  %v394_v51 = vrot.slane %v372_v48, %v3668_v46  ;;  %v402_v54 = vcombine.high %v380_v50, %v380_v50  ;;  %v507_v55 = vrot.slane %v380_v50, %v3674_v52  ;;  %v373_v57 = vcombine.high %v371_v53, %v371_v53 }
 0x11b   :  { %v348_v37 = vpop.f32.mrf.mxu0  ;;  %v387_v63 = vrot.slane %v371_v53, %v3668_v46  ;;  %v443_v30 = vrot.slane %v421_v15, %v3668_v46  ;;  %v451_v32 = vcombine.high %v429_v18, %v429_v18 }
 0x11c   :  { %v3659_v39 = vadd.f32 %v2745_v35, %v348_v37  ;;  %v511_v56 = vrot.slane %v394_v51, %v3674_v52  ;;  %v404_v59 = vcombine.high %v394_v51, %v394_v51  ;;  %v515_v62 = vrot.slane %v402_v54, %v3674_v52 }
 0x11d   :  { %v2983_v40 = vpop.f32.mrf.mxu0  ;;  %v401_v5 = vrot.slane %v373_v57, %v3668_v46  ;;  %v523_v8 = vrot.slane %v387_v63, %v3674_v52  ;;  %v403_v9 = vcombine.high %v387_v63, %v387_v63  ;;  %v422_v35 = vcombine.high %v420_v27, %v420_v27 }
 0x11e   :  { %1632 = vrot.lane.b32.xlu0 %v239_v28, %s3477_s14  ;;  %628 = vrot.lane.b32.xlu1 %v3659_v39, %s3486_s20  ;;  %v519_v3 = vrot.slane %v404_v59, %v3674_v52  ;;  %v462_v36 = vrot.slane %v3659_v39, %v3668_v46  ;;  %v543_v37 = vrot.slane %v443_v30, %v3674_v52 }
 0x11f   :  { %v351_v41 = vpop.f32.mrf.mxu0  ;;  %v527_v16 = vrot.slane %v401_v5, %v3674_v52  ;;  %v405_v17 = vcombine.high %v401_v5, %v401_v5  ;;  %v531_v19 = vrot.slane %v403_v9, %v3674_v52  ;;  %v453_v38 = vcombine.high %v443_v30, %v443_v30 }
 0x120   :  { %v547_v40 = vrot.slane %v451_v32, %v3674_v52  ;;  %v436_v41 = vrot.slane %v420_v27, %v3668_v46  ;;  %v455_v44 = vcombine.high %v3659_v39, %v3659_v39  ;;  %v470_v45 = vcombine.high %v462_v36, %v462_v36 }
 0x121   :  { %v2984_v42 = vpop.f32.mrf.mxu0  ;;  %v535_v29 = vrot.slane %v405_v17, %v3674_v52  ;;  %v551_v47 = vrot.slane %v453_v38, %v3674_v52  ;;  %v450_v48 = vrot.slane %v422_v35, %v3668_v46  ;;  %v478_v49 = vrot.slane %v462_v36, %v3668_v46 }
 0x122   :  { %1634 = vrot.lane.b32.xlu1 %v294_v31, %s3477_s14  ;;  %v539_v31 = vrot.slane %v429_v18, %v3674_v52  ;;  %v555_v50 = vrot.slane %v436_v41, %v3674_v52  ;;  %v452_v51 = vcombine.high %v436_v41, %v436_v41  ;;  %v492_v57 = vrot.slane %v470_v45, %v3668_v46 }
 0x123   :  { %v571_v59 = vrot.slane %v478_v49, %v3674_v52 }
 0x124   :  { %v502_v5 = vcombine.high %v492_v57, %v492_v57 }
 0x126   :  { %1636 = vrot.lane.b32.xlu1 %v3659_v39, %s3477_s14  ;;  %v559_v39 = vrot.slane %v450_v48, %v3674_v52  ;;  %v583_v15 = vrot.slane %v502_v5, %v3674_v52 }
 0x188   :  { %v625_v58 = vpop.permute.xlu0 %624 }
 0x189   :  { %v633_v60 = vmul.f32 %v625_v58, %v507_v55  ;;  %v634_v61 = vmul.f32 %v625_v58, %v511_v56  ;;  %v635_v1 = vmul.f32 %v625_v58, %v515_v62  ;;  %v636_v10 = vmul.f32 %v625_v58, %v519_v3 }
 0x18a   :  { %v637_v11 = vmul.f32 %v625_v58, %v523_v8  ;;  %v638_v25 = vmul.f32 %v625_v58, %v527_v16  ;;  %v639_v26 = vmul.f32 %v625_v58, %v531_v19  ;;  %v640_v33 = vmul.f32 %v625_v58, %v535_v29 }
 0x18b   :  { %2993 = vmatprep.mubr.msk.f32.mxu1 %vm200_vm1, %v633_v60  ;;  %v469_v55 = vrot.slane %v455_v44, %v3668_v46  ;;  %v454_v56 = vcombine.high %v450_v48, %v450_v48  ;;  %v563_v58 = vrot.slane %v452_v51, %v3674_v52  ;;  %v500_v60 = vcombine.high %v478_v49, %v478_v49 }
 0x18c   :  { %2994 = vmatmul.mubr.msk.f32.vlgmr.msra.gmra.mxu1 %vm200_vm1, %v634_v61  ;;  %v627_v28 = vpop.permute.xlu0 %626  ;;  %v575_v3 = vrot.slane %v492_v57, %v3674_v52 }
 0x18d   :  { %2996 = vmatprep.mubr.msk.f32.mxu1 %vm200_vm1, %v635_v1  ;;  %v641_v34 = vmul.f32 %v627_v28, %v539_v31  ;;  %v642_v42 = vmul.f32 %v627_v28, %v543_v37  ;;  %v643_v43 = vmul.f32 %v627_v28, %v547_v40  ;;  %v644_v53 = vmul.f32 %v627_v28, %v551_v47 }
 0x18e   :  { %v645_v54 = vmul.f32 %v627_v28, %v555_v50  ;;  %v646_v61 = vmul.f32 %v627_v28, %v559_v39  ;;  %v647_v62 = vmul.f32 %v627_v28, %v563_v58  ;;  %v471_v63 = vcombine.high %v469_v55, %v469_v55 }
 0x18f   :  { %v567_v2 = vrot.slane %v454_v56, %v3674_v52  ;;  %v579_v9 = vrot.slane %v500_v60, %v3674_v52 }
 0x190   :  { %2997 = vmatmul.mubr.msk.f32.gmra.mxu1 %vm200_vm1, %v636_v10  ;;  %v629_v1 = vpop.permute.xlu1 %628  ;;  %v485_v10 = vrot.slane %v469_v55, %v3668_v46  ;;  %v499_v16 = vrot.slane %v471_v63, %v3668_v46 }
 0x191   :  { %2999 = vmatprep.mubr.msk.f32.mxu1 %vm200_vm1, %v637_v11  ;;  %v649_v8 = vmul.f32 %v629_v1, %v571_v59  ;;  %v648_v11 = vmul.f32 %v627_v28, %v567_v2  ;;  %v650_v13 = vmul.f32 %v629_v1, %v575_v3  ;;  %v651_v17 = vmul.f32 %v629_v1, %v579_v9 }
 0x192   :  { %v587_v18 = vrot.slane %v485_v10, %v3674_v52  ;;  %v501_v19 = vcombine.high %v485_v10, %v485_v10  ;;  %v503_v27 = vcombine.high %v499_v16, %v499_v16 }
 0x194   :  { %3000 = vmatmul.mubr.msk.f32.gmra.mxu1 %vm200_vm1, %v638_v25  ;;  %v652_v25 = vmul.f32 %v629_v1, %v583_v15  ;;  %v653_v28 = vmul.f32 %v629_v1, %v587_v18  ;;  %v595_v29 = vrot.slane %v501_v19, %v3674_v52  ;;  %v599_v30 = vrot.slane %v503_v27, %v3674_v52 }
 0x195   :  { %3002 = vmatprep.mubr.msk.f32.mxu1 %vm200_vm1, %v639_v26  ;;  %v591_v26 = vrot.slane %v499_v16, %v3674_v52 }
 0x196   :  { %v655_v31 = vmul.f32 %v629_v1, %v595_v29  ;;  %v656_v32 = vmul.f32 %v629_v1, %v599_v30 }
 0x197   :  { %v654_v46 = vmul.f32 %v629_v1, %v591_v26 }
 0x198   :  { %3003 = vmatmul.mubr.msk.f32.gmra.mxu1 %vm200_vm1, %v640_v33  ;;  %v149_v33 = vadd.s32 1, %v3596_v12 }
 0x199   :  { %3005 = vmatprep.mubr.msk.f32.mxu1 %vm200_vm1, %v641_v34  ;;  %v147_v34 = vmul.u32 8, %v3596_v12 }
 0x19a   :  { %v150_v35 = vmul.u32 8, %v149_v33 }
 0x19b   :  { %vm148_vm14 = vcmp.ge.s32.totalorder %v3599_v14, %v147_v34 }
 0x19c   :  { %3006 = vmatmul.mubr.msk.f32.gmra.mxu1 %vm200_vm1, %v642_v42  ;;  %vm151_vm15 = vcmp.lt.s32.totalorder %v3599_v14, %v150_v35 }
 0x19d   :  { %3008 = vmatprep.mubr.msk.f32.mxu1 %vm200_vm1, %v643_v43  ;;  %vm152_vm2 = vmand %vm148_vm14, %vm151_vm15  ;;  %vm1916_vm14 = vcmask 1046534   ;;  %vm1918_vm15 = vcmask 1047559  }
 0x19e   :  { %v3749_v52 = vsel %vm152_vm2, 1.0, %v4280_v0 }
 0x19f   :  { %3029 = vmatprep.subr.msk.mxu0 %vm1443_vm3, %v3749_v52 }
 0x1a0   :  { %3009 = vmatmul.mubr.msk.f32.gmra.mxu1 %vm200_vm1, %v644_v53  ;;  %3030 = vmatpush3.msk.msra.mxu0 %vm1443_vm3, %v3749_v52 }
 0x1a1   :  { %3011 = vmatprep.mubr.msk.f32.mxu1 %vm200_vm1, %v645_v54  ;;  %3075 = vmatprep.subr.bf16.mxu0 %v4280_v0 }
 0x1a4   :  { %3012 = vmatmul.mubr.msk.f32.gmra.mxu1 %vm200_vm1, %v646_v61 }
 0x1a5   :  { %3014 = vmatprep.mubr.msk.f32.mxu1 %vm200_vm1, %v647_v62 }
 0x1a8   :  { %3015 = vmatmul.mubr.msk.f32.gmra.mxu1 %vm200_vm1, %v648_v11 }
 0x1a9   :  { %3017 = vmatprep.mubr.msk.f32.mxu1 %vm200_vm1, %v649_v8 }
 0x1ac   :  { %3018 = vmatmul.mubr.msk.f32.gmra.mxu1 %vm200_vm1, %v650_v13 }
 0x1ad   :  { %3020 = vmatprep.mubr.msk.f32.mxu1 %vm200_vm1, %v651_v17 }
 0x1b0   :  { %3021 = vmatmul.mubr.msk.f32.gmra.mxu1 %vm200_vm1, %v652_v25 }
 0x1b1   :  { %3023 = vmatprep.mubr.msk.f32.mxu1 %vm200_vm1, %v653_v28 }
 0x1b4   :  { %3024 = vmatmul.mubr.msk.f32.gmra.mxu1 %vm200_vm1, %v654_v46 }
 0x1b5   :  { %3026 = vmatprep.mubr.msk.f32.mxu1 %vm200_vm1, %v655_v31 }
 0x1b8   :  { %3027 = vmatmul.mubr.msk.f32.gmra.mxu1 %vm200_vm1, %v656_v32 }
 0x1b9   :  { %3071 = vmatprep.mubr.msk.bf16.mxu1 %vm3484_vm0, %v4280_v0 }
 0x24c   :  { %v2995_v12 = vpop.f32.mrf.mxu1 }
 0x24d   :  { %v922_v36 = vsel %vm914_vm4, %v2995_v12, -inf }
 0x24e   :  { %v923_v37 = vrot.slane %v922_v36, 4  ;;  %v795_v38 = vpop.f32.mrf.mxu1 }
 0x24f   :  { %v915_v14 = vsel %vm914_vm4, %v795_v38, -inf }
 0x250   :  { %v924_v40 = vmax.f32 %v922_v36, %v923_v37  ;;  %v916_v41 = vrot.slane %v915_v14, 4  ;;  %v2998_v42 = vpop.f32.mrf.mxu1 }
 0x251   :  { %v936_v43 = vsel %vm914_vm4, %v2998_v42, -inf }
 0x252   :  { %v925_v44 = vrot.slane %v924_v40, 2  ;;  %v917_v45 = vmax.f32 %v915_v14, %v916_v41  ;;  %v937_v47 = vrot.slane %v936_v43, 4  ;;  %v805_v48 = vpop.f32.mrf.mxu1 }
 0x253   :  { %v929_v49 = vsel %vm914_vm4, %v805_v48, -inf }
 0x254   :  { %v926_v50 = vmax.f32 %v924_v40, %v925_v44  ;;  %v918_v51 = vrot.slane %v917_v45, 2  ;;  %v938_v53 = vmax.f32 %v936_v43, %v937_v47  ;;  %v930_v54 = vrot.slane %v929_v49, 4  ;;  %v3760_v55 = vpop.f32.mrf.mxu1 }
 0x255   :  { %v950_v39 = vsel %vm914_vm4, %v3760_v55, -inf }
 0x256   :  { %v927_v56 = vrot.slane %v926_v50, 1  ;;  %v919_v57 = vmax.f32 %v917_v45, %v918_v51  ;;  %v939_v58 = vrot.slane %v938_v53, 2  ;;  %v931_v59 = vmax.f32 %v929_v49, %v930_v54  ;;  %v3764_v60 = vpop.f32.mrf.mxu1 }
 0x257   :  { %v951_v61 = vrot.slane %v950_v39, 4  ;;  %v943_v62 = vsel %vm914_vm4, %v3764_v60, -inf }
 0x258   :  { %v928_v63 = vmax.f32 %v926_v50, %v927_v56  ;;  %v920_v1 = vrot.slane %v919_v57, 1  ;;  %v940_v2 = vmax.f32 %v938_v53, %v939_v58  ;;  %v932_v3 = vrot.slane %v931_v59, 2  ;;  %v3768_v5 = vpop.f32.mrf.mxu1 }
 0x259   :  { %v952_v8 = vmax.f32 %v950_v39, %v951_v61  ;;  %v944_v9 = vrot.slane %v943_v62, 4  ;;  %v964_v10 = vsel %vm914_vm4, %v3768_v5, -inf }
 0x25a   :  { %v1084_v11 = vsub.f32 %v2995_v12, %v928_v63  ;;  %v921_v13 = vmax.f32 %v919_v57, %v920_v1  ;;  %v941_v15 = vrot.slane %v940_v2, 1  ;;  %v933_v16 = vmax.f32 %v931_v59, %v932_v3  ;;  %v3772_v17 = vpop.f32.mrf.mxu1 }
 0x25b   :  { %v953_v18 = vrot.slane %v952_v8, 2  ;;  %v945_v19 = vmax.f32 %v943_v62, %v944_v9  ;;  %v965_v25 = vrot.slane %v964_v10, 4  ;;  %v957_v26 = vsel %vm914_vm4, %v3772_v17, -inf }
 0x25c   :  { %v1109_v27 = vmul.f32 1.442695, %v1084_v11  ;;  %v1083_v28 = vsub.f32 %v795_v38, %v921_v13  ;;  %v942_v29 = vmax.f32 %v940_v2, %v941_v15  ;;  %v934_v46 = vrot.slane %v933_v16, 1  ;;  %v3776_v30 = vpop.f32.mrf.mxu1 }
 0x25d   :  { %v954_v31 = vmax.f32 %v952_v8, %v953_v18  ;;  %v946_v32 = vrot.slane %v945_v19, 2  ;;  %v966_v33 = vmax.f32 %v964_v10, %v965_v25  ;;  %v958_v34 = vrot.slane %v957_v26, 4 }
 0x25e   :  { %3204 = vpow2.f32 %v1109_v27  ;;  %v1107_v35 = vmul.f32 1.442695, %v1083_v28  ;;  %v1086_v12 = vsub.f32 %v2998_v42, %v942_v29  ;;  %v935_v36 = vmax.f32 %v933_v16, %v934_v46  ;;  %v3778_v37 = vpop.f32.mrf.mxu1 }
 0x25f   :  { %v955_v14 = vrot.slane %v954_v31, 1  ;;  %v947_v40 = vmax.f32 %v945_v19, %v946_v32  ;;  %v967_v41 = vrot.slane %v966_v33, 2  ;;  %v959_v43 = vmax.f32 %v957_v26, %v958_v34 }
 0x260   :  { %3206 = vpow2.f32 %v1107_v35  ;;  %v1113_v38 = vmul.f32 1.442695, %v1086_v12  ;;  %v1085_v44 = vsub.f32 %v805_v48, %v935_v36  ;;  %v978_v45 = vsel %vm914_vm4, %v3776_v30, -inf  ;;  %v3782_v47 = vpop.f32.mrf.mxu1 }
 0x261   :  { %v956_v49 = vmax.f32 %v954_v31, %v955_v14  ;;  %v948_v50 = vrot.slane %v947_v40, 1  ;;  %v968_v51 = vmax.f32 %v966_v33, %v967_v41  ;;  %v960_v53 = vrot.slane %v959_v43, 2 }
 0x262   :  { %3208 = vpow2.f32 %v1113_v38  ;;  %v1111_v42 = vmul.f32 1.442695, %v1085_v44  ;;  %v979_v54 = vrot.slane %v978_v45, 4  ;;  %v971_v39 = vsel %vm914_vm4, %v3778_v37, -inf  ;;  %v3786_v56 = vpop.f32.mrf.mxu1 }
 0x263   :  { %v1088_v57 = vsub.f32 %v3760_v55, %v956_v49  ;;  %v949_v48 = vmax.f32 %v947_v40, %v948_v50  ;;  %v969_v58 = vrot.slane %v968_v51, 1  ;;  %v961_v59 = vmax.f32 %v959_v43, %v960_v53 }
 0x264   :  { %3210 = vpow2.f32 %v1111_v42  ;;  %v980_v61 = vmax.f32 %v978_v45, %v979_v54  ;;  %v972_v62 = vrot.slane %v971_v39, 4  ;;  %v992_v63 = vsel %vm914_vm4, %v3782_v47, -inf  ;;  %v3794_v13 = vpop.f32.mrf.mxu1 }
 0x265   :  { %v1117_v1 = vmul.f32 1.442695, %v1088_v57  ;;  %v1087_v2 = vsub.f32 %v3764_v60, %v949_v48  ;;  %v970_v3 = vmax.f32 %v968_v51, %v969_v58  ;;  %v962_v8 = vrot.slane %v961_v59, 1 }
 0x266   :  { %v981_v9 = vrot.slane %v980_v61, 2  ;;  %v973_v10 = vmax.f32 %v971_v39, %v972_v62  ;;  %v993_v11 = vrot.slane %v992_v63, 4  ;;  %v985_v55 = vsel %vm914_vm4, %v3786_v56, -inf  ;;  %v3813_v54 = vpop.f32.mrf.mxu1 }
 0x267   :  { %3212 = vpow2.f32 %v1117_v1  ;;  %v1115_v15 = vmul.f32 1.442695, %v1087_v2  ;;  %v1090_v16 = vsub.f32 %v3768_v5, %v970_v3  ;;  %v963_v18 = vmax.f32 %v961_v59, %v962_v8 }
 0x268   :  { %v982_v19 = vmax.f32 %v980_v61, %v981_v9  ;;  %v974_v25 = vrot.slane %v973_v10, 2  ;;  %v994_v26 = vmax.f32 %v992_v63, %v993_v11  ;;  %v986_v27 = vrot.slane %v985_v55, 4  ;;  %v3822_v2 = vpop.f32.mrf.mxu1 }
 0x269   :  { %3214 = vpow2.f32 %v1115_v15  ;;  %v1121_v60 = vmul.f32 1.442695, %v1090_v16  ;;  %v1089_v28 = vsub.f32 %v3772_v17, %v963_v18  ;;  %v1006_v29 = vsel %vm914_vm4, %v3794_v13, -inf }
 0x26a   :  { %v983_v46 = vrot.slane %v982_v19, 1  ;;  %v975_v31 = vmax.f32 %v973_v10, %v974_v25  ;;  %v995_v32 = vrot.slane %v994_v26, 2  ;;  %v987_v33 = vmax.f32 %v985_v55, %v986_v27  ;;  %v3832_v27 = vpop.f32.mrf.mxu1 }
 0x26b   :  { %v3800_v34 = vpop.eup %3204  ;;  %3216 = vpow2.f32 %v1121_v60  ;;  %v1119_v35 = vmul.f32 1.442695, %v1089_v28  ;;  %v1007_v36 = vrot.slane %v1006_v29, 4 }
 0x26c   :  { %v1162_v5 = vsel %vm914_vm4, %v3800_v34, 0.0  ;;  %v984_v12 = vmax.f32 %v982_v19, %v983_v46  ;;  %v976_v17 = vrot.slane %v975_v31, 1  ;;  %v996_v43 = vmax.f32 %v994_v26, %v995_v32 }
 0x26d   :  { %v3804_v14 = vpop.eup %3206  ;;  %v1163_v40 = vrot.slane %v1162_v5, 4  ;;  %v988_v38 = vrot.slane %v987_v33, 2  ;;  %3218 = vpow2.f32 %v1119_v35  ;;  %v1008_v51 = vmax.f32 %v1006_v29, %v1007_v36 }
 0x26e   :  { %v1155_v41 = vsel %vm914_vm4, %v3804_v14, 0.0  ;;  %v1092_v50 = vsub.f32 %v3776_v30, %v984_v12  ;;  %v977_v42 = vmax.f32 %v975_v31, %v976_v17  ;;  %v997_v39 = vrot.slane %v996_v43, 1 }
 0x26f   :  { %v3808_v44 = vpop.eup %3208  ;;  %v1164_v45 = vadd.f32 %v1163_v40, %v1162_v5  ;;  %v1156_v49 = vrot.slane %v1155_v41, 4  ;;  %v989_v57 = vmax.f32 %v987_v33, %v988_v38  ;;  %v1009_v63 = vrot.slane %v1008_v51, 2 }
 0x270   :  { %v1176_v58 = vsel %vm914_vm4, %v3808_v44, 0.0  ;;  %v1125_v62 = vmul.f32 1.442695, %v1092_v50  ;;  %v1091_v1 = vsub.f32 %v3778_v37, %v977_v42  ;;  %v998_v10 = vmax.f32 %v996_v43, %v997_v39  ;;  %v3843_v43 = vpop.f32.mrf.mxu1 }
 0x271   :  { %v3811_v53 = vpop.eup %3210  ;;  %v1165_v48 = vrot.slane %v1164_v45, 2  ;;  %v1157_v61 = vadd.f32 %v1156_v49, %v1155_v41  ;;  %v1177_v8 = vrot.slane %v1176_v58, 4  ;;  %v990_v11 = vrot.slane %v989_v57, 1 }
 0x272   :  { %v1169_v30 = vsel %vm914_vm4, %v3811_v53, 0.0  ;;  %3220 = vpow2.f32 %v1125_v62  ;;  %v1010_v19 = vmax.f32 %v1008_v51, %v1009_v63  ;;  %v1123_v26 = vmul.f32 1.442695, %v1091_v1 }
 0x273   :  { %v1166_v55 = vadd.f32 %v1165_v48, %v1164_v45  ;;  %v1158_v16 = vrot.slane %v1157_v61, 2  ;;  %v1170_v18 = vrot.slane %v1169_v30, 4  ;;  %v999_v37 = vsel %vm914_vm4, %v3813_v54, -inf }
 0x274   :  { %v3817_v59 = vpop.eup %3212  ;;  %v1178_v60 = vadd.f32 %v1177_v8, %v1176_v58  ;;  %v1094_v29 = vsub.f32 %v3782_v47, %v998_v10  ;;  %v991_v46 = vmax.f32 %v989_v57, %v990_v11  ;;  %v1011_v35 = vrot.slane %v1010_v19, 1 }
 0x275   :  { %v1190_v9 = vsel %vm914_vm4, %v3817_v59, 0.0  ;;  %v1167_v31 = vrot.slane %v1166_v55, 1  ;;  %v1159_v32 = vadd.f32 %v1158_v16, %v1157_v61  ;;  %v1171_v33 = vadd.f32 %v1170_v18, %v1169_v30  ;;  %v3848_v30 = vpop.f32.mrf.mxu1 }
 0x276   :  { %v3824_v3 = vpop.eup %3214  ;;  %v1191_v25 = vrot.slane %v1190_v9, 4  ;;  %v1000_v17 = vrot.slane %v999_v37, 4  ;;  %v1020_v41 = vsel %vm914_vm4, %v3822_v2, -inf  ;;  %v1179_v38 = vrot.slane %v1178_v60, 2 }
 0x277   :  { %v1183_v28 = vsel %vm914_vm4, %v3824_v3, 0.0  ;;  %3222 = vpow2.f32 %v1123_v26  ;;  %v1129_v47 = vmul.f32 1.442695, %v1094_v29  ;;  %v1093_v45 = vsub.f32 %v3786_v56, %v991_v46 }
 0x278   :  { %v3828_v15 = vpop.eup %3216  ;;  %v1192_v36 = vadd.f32 %v1191_v25, %v1190_v9  ;;  %v1184_v40 = vrot.slane %v1183_v28, 4  ;;  %v1168_v49 = vadd.f32 %v1167_v31, %v1166_v55  ;;  %v1001_v51 = vmax.f32 %v999_v37, %v1000_v17 }
 0x279   :  { %v1204_v5 = vsel %vm914_vm4, %v3828_v15, 0.0  ;;  %v1160_v42 = vrot.slane %v1159_v32, 1  ;;  %v1172_v39 = vrot.slane %v1171_v33, 2  ;;  %v1021_v48 = vrot.slane %v1020_v41, 4 }
 0x27a   :  { %v3839_v12 = vpop.eup %3218  ;;  %v1205_v50 = vrot.slane %v1204_v5, 4  ;;  %v1193_v58 = vrot.slane %v1192_v36, 2  ;;  %v1185_v61 = vadd.f32 %v1184_v40, %v1183_v28  ;;  %v1012_v62 = vmax.f32 %v1010_v19, %v1011_v35 }
 0x27b   :  { %v1197_v57 = vsel %vm914_vm4, %v3839_v12, 0.0  ;;  %v1002_v63 = vrot.slane %v1001_v51, 2  ;;  %v1180_v1 = vadd.f32 %v1179_v38, %v1178_v60  ;;  %3224 = vpow2.f32 %v1129_v47  ;;  %v3857_v60 = vpop.f32.mrf.mxu1 }
 0x27c   :  { %v1127_v8 = vmul.f32 1.442695, %v1093_v45  ;;  %v1206_v9 = vadd.f32 %v1205_v50, %v1204_v5  ;;  %v1198_v56 = vrot.slane %v1197_v57, 4  ;;  %v1013_v11 = vsel %vm914_vm4, %v3832_v27, -inf }
 0x27d   :  { %v1003_v10 = vmax.f32 %v1001_v51, %v1002_v63  ;;  %3226 = vrcp.f32 %v1168_v49  ;;  %v3852_v55 = vadd.f32 %v1160_v42, %v1159_v32  ;;  %v1022_v16 = vmax.f32 %v1020_v41, %v1021_v48  ;;  %v3863_v45 = vpop.f32.mrf.mxu1 }
 0x27e   :  { %v1173_v25 = vadd.f32 %v1172_v39, %v1171_v33  ;;  %v1194_v19 = vadd.f32 %v1193_v58, %v1192_v36  ;;  %v1186_v26 = vrot.slane %v1185_v61, 2  ;;  %v1096_v37 = vsub.f32 %v3794_v13, %v1012_v62 }
 0x27f   :  { %v3854_v18 = vpop.eup %3220  ;;  %v1181_v28 = vrot.slane %v1180_v1, 1  ;;  %v1004_v29 = vrot.slane %v1003_v10, 1  ;;  %v1023_v46 = vrot.slane %v1022_v16, 2  ;;  %v1014_v31 = vrot.slane %v1013_v11, 4 }
 0x280   :  { %v1207_v5 = vrot.slane %v1206_v9, 2  ;;  %v1199_v35 = vadd.f32 %v1198_v56, %v1197_v57  ;;  %3228 = vpow2.f32 %v1127_v8  ;;  %v1034_v32 = vsel %vm914_vm4, %v3843_v43, -inf }
 0x281   :  { %v1218_v40 = vsel %vm914_vm4, %v3854_v18, 0.0  ;;  %v1005_v33 = vmax.f32 %v1003_v10, %v1004_v29  ;;  %v1024_v36 = vmax.f32 %v1022_v16, %v1023_v46  ;;  %v1015_v17 = vmax.f32 %v1013_v11, %v1014_v31  ;;  %v3878_v16 = vpop.f32.mrf.mxu1 }
 0x282   :  { %v1174_v41 = vrot.slane %v1173_v25, 1  ;;  %v1195_v13 = vrot.slane %v1194_v19, 1  ;;  %v1187_v38 = vadd.f32 %v1186_v26, %v1185_v61  ;;  %v1133_v47 = vmul.f32 1.442695, %v1096_v37 }
 0x283   :  { %v1095_v49 = vsub.f32 %v3813_v54, %v1005_v33  ;;  %v1025_v50 = vrot.slane %v1024_v36, 1  ;;  %v1016_v51 = vrot.slane %v1015_v17, 2  ;;  %v1035_v42 = vrot.slane %v1034_v32, 4 }
 0x284   :  { %v3866_v39 = vpop.eup %3222  ;;  %v3868_v57 = vadd.f32 %v1181_v28, %v1180_v1  ;;  %v3870_v48 = vadd.f32 %v1207_v5, %v1206_v9  ;;  %v1200_v58 = vrot.slane %v1199_v35, 2  ;;  %v1219_v62 = vrot.slane %v1218_v40, 4 }
 0x285   :  { %v1131_v63 = vmul.f32 1.442695, %v1095_v49  ;;  %v1026_v8 = vmax.f32 %v1024_v36, %v1025_v50  ;;  %v1017_v56 = vmax.f32 %v1015_v17, %v1016_v51  ;;  %v1036_v61 = vmax.f32 %v1034_v32, %v1035_v42 }
 0x286   :  { %v3872_v10 = vadd.f32 %v1174_v41, %v1173_v25  ;;  %v3874_v11 = vadd.f32 %v1195_v13, %v1194_v19  ;;  %3230 = vpow2.f32 %v1133_v47  ;;  %v1027_v54 = vsel %vm914_vm4, %v3848_v30, -inf }
 0x287   :  { %v1188_v1 = vrot.slane %v1187_v38, 1  ;;  %v1211_v9 = vsel %vm914_vm4, %v3866_v39, 0.0  ;;  %v1018_v26 = vrot.slane %v1017_v56, 1  ;;  %v1037_v37 = vrot.slane %v1036_v61, 2 }
 0x288   :  { %v3882_v28 = vpop.eup %3224  ;;  %v3885_v25 = vadd.f32 %v1200_v58, %v1199_v35  ;;  %v3887_v19 = vadd.f32 %v1219_v62, %v1218_v40  ;;  %v1028_v46 = vrot.slane %v1027_v54, 4  ;;  %3232 = vpow2.f32 %v1131_v63  ;;  %v3896_v35 = vpop.f32.mrf.mxu1 }
 0x289   :  { %v1098_v31 = vsub.f32 %v3822_v2, %v1026_v8  ;;  %v1019_v5 = vmax.f32 %v1017_v56, %v1018_v26  ;;  %v1038_v32 = vmax.f32 %v1036_v61, %v1037_v37  ;;  %v1212_v36 = vrot.slane %v1211_v9, 4 }
 0x28a   :  { %v3890_v33 = vpop.eup %3226  ;;  %v1029_v17 = vmax.f32 %v1027_v54, %v1028_v46  ;;  %v1048_v41 = vsel %vm914_vm4, %v3857_v60, -inf  ;;  %v1041_v13 = vsel %vm914_vm4, %v3863_v45, -inf  ;;  %v3898_v40 = vadd.f32 %v1188_v1, %v1187_v38  ;;  %v3910_v37 = vpop.f32.mrf.mxu1 }
 0x28b   :  { %v3902_v47 = vsel %vm914_vm4, %v3882_v28, 0.0  ;;  %v1097_v2 = vsub.f32 %v3832_v27, %v1019_v5  ;;  %v1039_v49 = vrot.slane %v1038_v32, 1  ;;  %v1049_v42 = vrot.slane %v1048_v41, 4 }
 0x28c   :  { %v1030_v51 = vrot.slane %v1029_v17, 2  ;;  %v1042_v58 = vrot.slane %v1041_v13, 4  ;;  %v1137_v63 = vmul.f32 1.442695, %v1098_v31  ;;  %v1062_v38 = vsel %vm914_vm4, %v3878_v16, -inf }
 0x28d   :  { %v3906_v62 = vpop.eup %3228  ;;  %v1135_v8 = vmul.f32 1.442695, %v1097_v2  ;;  %v1040_v56 = vmax.f32 %v1038_v32, %v1039_v49  ;;  %v1050_v54 = vmax.f32 %v1048_v41, %v1049_v42  ;;  %v1063_v26 = vrot.slane %v1062_v38, 4  ;;  %v3919_v42 = vpop.f32.mrf.mxu1 }
 0x28e   :  { %v1031_v61 = vmax.f32 %v1029_v17, %v1030_v51  ;;  %v1043_v1 = vmax.f32 %v1041_v13, %v1042_v58  ;;  %v3912_v27 = vadd.f32 %v1212_v36, %v1211_v9  ;;  %v1055_v5 = vsel %vm914_vm4, %v3896_v35, -inf }
 0x28f   :  { %3234 = vpow2.f32 %v1135_v8  ;;  %v1100_v46 = vsub.f32 %v3843_v43, %v1040_v56  ;;  %v1051_v2 = vrot.slane %v1050_v54, 2  ;;  %v1064_v49 = vmax.f32 %v1062_v38, %v1063_v26 }
 0x290   :  { %v1032_v31 = vrot.slane %v1031_v61, 1  ;;  %v1044_v32 = vrot.slane %v1043_v1, 2  ;;  %3236 = vpow2.f32 %v1137_v63  ;;  %v1056_v17 = vrot.slane %v1055_v5, 4 }
 0x291   :  { %v1141_v21 = vmul.f32 1.442695, %v1100_v46  ;;  %v1076_v41 = vsel %vm914_vm4, %v3910_v37, -inf  ;;  %v1052_v51 = vmax.f32 %v1050_v54, %v1051_v2  ;;  %v1065_v36 = vrot.slane %v1064_v49, 2 }
 0x292   :  { %v1033_v13 = vmax.f32 %v1031_v61, %v1032_v31  ;;  %v1045_v9 = vmax.f32 %v1043_v1, %v1044_v32  ;;  %v1233_v58 = vrot.slane %v3902_v47, 4  ;;  %v1057_v8 = vmax.f32 %v1055_v5, %v1056_v17 }
 0x293   :  { %v3921_v43 = vpop.eup %3230  ;;  %3238 = vpow2.f32 %v1141_v21  ;;  %v1077_v56 = vrot.slane %v1076_v41, 4  ;;  %v1053_v38 = vrot.slane %v1052_v51, 1  ;;  %v1066_v46 = vmax.f32 %v1064_v49, %v1065_v36 }
 0x294   :  { %v1099_v63 = vsub.f32 %v3848_v30, %v1033_v13  ;;  %v1046_v26 = vrot.slane %v1045_v9, 1  ;;  %v1225_v61 = vsel %vm914_vm4, %v3906_v62, 0.0  ;;  %v1058_v54 = vrot.slane %v1057_v8, 2 }
 0x295   :  { %v1078_v1 = vmax.f32 %v1076_v41, %v1077_v56  ;;  %v1069_v31 = vsel %vm914_vm4, %v3919_v42, -inf  ;;  %v3929_v2 = vpop.eup %3232  ;;  %v1214_v32 = vrot.slane %v3912_v27, 2  ;;  %v1054_v5 = vmax.f32 %v1052_v51, %v1053_v38 }
 0x296   :  { %v1139_v21 = vmul.f32 1.442695, %v1099_v63  ;;  %v1047_v17 = vmax.f32 %v1045_v9, %v1046_v26  ;;  %v1067_v7 = vrot.slane %v1066_v46, 1  ;;  %v1059_v30 = vmax.f32 %v1057_v8, %v1058_v54 }
 0x297   :  { %v1079_v13 = vrot.slane %v1078_v1, 2  ;;  %v1070_v0 = vrot.slane %v1069_v31, 4  ;;  %v1226_v49 = vrot.slane %v1225_v61, 4  ;;  %v1102_v36 = vsub.f32 %v3857_v60, %v1054_v5 }
 0x298   :  { %3240 = vpow2.f32 %v1139_v21  ;;  %v1101_v41 = vsub.f32 %v3863_v45, %v1047_v17  ;;  %v1239_v56 = vsel %vm914_vm4, %v3929_v2, 0.0  ;;  %v1068_v29 = vmax.f32 %v1066_v46, %v1067_v7 }
 0x299   :  { %v1060_v50 = vrot.slane %v1059_v30, 1  ;;  %v1080_v24 = vmax.f32 %v1078_v1, %v1079_v13  ;;  %v1234_v63 = vadd.f32 %v1233_v58, %v3902_v47  ;;  %v1246_v51 = vsel %vm914_vm4, %v3921_v43, 0.0 }
 0x29a   :  { %v1145_v9 = vmul.f32 1.442695, %v1102_v36  ;;  %v1143_v8 = vmul.f32 1.442695, %v1101_v41  ;;  %v1104_v38 = vsub.f32 %v3878_v16, %v1068_v29  ;;  %v1071_v60 = vmax.f32 %v1069_v31, %v1070_v0 }
 0x29b   :  { %v1061_v26 = vmax.f32 %v1059_v30, %v1060_v50  ;;  %v1081_v54 = vrot.slane %v1080_v24, 1  ;;  %v4292_v45 = vrot.slane %v3887_v19, 2  ;;  %v1227_v46 = vadd.f32 %v1226_v49, %v1225_v61 }
 0x29c   :  { %v3940_v21 = vpop.eup %3234  ;;  %v1240_v1 = vrot.slane %v1239_v56, 4  ;;  %3242 = vpow2.f32 %v1145_v9  ;;  %v1149_v58 = vmul.f32 1.442695, %v1104_v38  ;;  %v1202_v0 = vrot.slane %v3885_v25, 1 }
 0x29d   :  { %v1222_v7 = vadd.f32 %v4292_v45, %v3887_v19  ;;  %v1253_v47 = vsel %vm914_vm4, %v3940_v21, 0.0  ;;  %3244 = vpow2.f32 %v1143_v8  ;;  %v1103_v5 = vsub.f32 %v3896_v35, %v1061_v26  ;;  %v3948_v16 = vpop.eup %3236 }
 0x29e   :  { %v1215_v29 = vadd.f32 %v1214_v32, %v3912_v27  ;;  %v1247_v50 = vrot.slane %v1246_v51, 4  ;;  %v1082_v31 = vmax.f32 %v1080_v24, %v1081_v54  ;;  %v1235_v17 = vrot.slane %v1234_v63, 2 }
 0x29f   :  { %3246 = vpow2.f32 %v1149_v58  ;;  %v1147_v19 = vmul.f32 1.442695, %v1103_v5  ;;  %v1072_v61 = vrot.slane %v1071_v60, 2  ;;  %v4293_v13 = vrot.slane %v3870_v48, 1 }
 0x2a0   :  { %v3952_v30 = vpop.eup %3238  ;;  %v1228_v35 = vrot.slane %v1227_v46, 2  ;;  %v1254_v36 = vrot.slane %v1253_v47, 4  ;;  %v1106_v41 = vsub.f32 %v3910_v37, %v1082_v31  ;;  %v1223_v9 = vrot.slane %v1222_v7, 1 }
 0x2a1   :  { %v3957_v49 = vadd.f32 %v4293_v13, %v3870_v48  ;;  %v1241_v8 = vadd.f32 %v1240_v1, %v1239_v56  ;;  %3248 = vpow2.f32 %v1147_v19  ;;  %v1073_v27 = vmax.f32 %v1071_v60, %v1072_v61 }
 0x2a2   :  { %v1203_v24 = vadd.f32 %v1202_v0, %v3885_v25  ;;  %v1216_v32 = vrot.slane %v1215_v29, 1  ;;  %v1248_v38 = vadd.f32 %v1247_v50, %v1246_v51  ;;  %v1153_v26 = vmul.f32 1.442695, %v1106_v41 }
 0x2a3   :  { %v1236_v54 = vadd.f32 %v1235_v17, %v1234_v63  ;;  %v1260_v45 = vsel %vm914_vm4, %v3948_v16, 0.0  ;;  %v1074_v58 = vrot.slane %v1073_v27, 1  ;;  %3250 = vrcp.f32 %v3852_v55 }
 0x2a4   :  { %v1229_v48 = vadd.f32 %v1228_v35, %v1227_v46  ;;  %v1255_v5 = vadd.f32 %v1254_v36, %v1253_v47  ;;  %v1274_v37 = vsel %vm914_vm4, %v3952_v30, 0.0  ;;  %3252 = vpow2.f32 %v1153_v26 }
 0x2a5   :  { %v3966_v56 = vpop.eup %3240  ;;  %v1224_v60 = vadd.f32 %v1223_v9, %v1222_v7  ;;  %v1242_v25 = vrot.slane %v1241_v8, 2  ;;  %v1075_v1 = vmax.f32 %v1073_v27, %v1074_v58  ;;  %3254 = vrcp.f32 %v3872_v10 }
 0x2a6   :  { %v1249_v63 = vrot.slane %v1248_v38, 2  ;;  %v1261_v51 = vrot.slane %v1260_v45, 4  ;;  %v1267_v0 = vsel %vm914_vm4, %v3966_v56, 0.0  ;;  %3256 = vrcp.f32 %v3868_v57 }
 0x2a7   :  { %v1275_v55 = vrot.slane %v1274_v37, 4  ;;  %v1268_v46 = vrot.slane %v1267_v0, 4  ;;  %v1105_v47 = vsub.f32 %v3919_v42, %v1075_v1  ;;  %3258 = vrcp.f32 %v3898_v40 }
 0x2a8   :  { %v1217_v50 = vadd.f32 %v1216_v32, %v1215_v29  ;;  %v1237_v31 = vrot.slane %v1236_v54, 1  ;;  %v1230_v7 = vrot.slane %v1229_v48, 1  ;;  %v1256_v17 = vrot.slane %v1255_v5, 2 }
 0x2a9   :  { %v3974_v19 = vpop.eup %3242  ;;  %v1243_v10 = vadd.f32 %v1242_v25, %v1241_v8  ;;  %v1269_v61 = vadd.f32 %v1268_v46, %v1267_v0  ;;  %v1151_v13 = vmul.f32 1.442695, %v1105_v47  ;;  %3260 = vrcp.f32 %v1203_v24 }
 0x2aa   :  { %v3976_v35 = vpop.eup %3244  ;;  %v1250_v36 = vadd.f32 %v1249_v63, %v1248_v38  ;;  %v1262_v57 = vadd.f32 %v1261_v51, %v1260_v45  ;;  %v1288_v41 = vsel %vm914_vm4, %v3974_v19, 0.0  ;;  %3262 = vrcp.f32 %v3874_v11 }
 0x2ab   :  { %v1276_v40 = vadd.f32 %v1275_v55, %v1274_v37  ;;  %v1289_v42 = vrot.slane %v1288_v41, 4  ;;  %v1281_v29 = vsel %vm914_vm4, %v3976_v35, 0.0  ;;  %3264 = vpow2.f32 %v1151_v13 }
 0x2ac   :  { %v3983_v9 = vpop.eup %3246  ;;  %v1238_v8 = vadd.f32 %v1237_v31, %v1236_v54  ;;  %v1257_v27 = vadd.f32 %v1256_v17, %v1255_v5  ;;  %v1270_v24 = vrot.slane %v1269_v61, 2  ;;  %v1282_v32 = vrot.slane %v1281_v29, 4 }
 0x2ad   :  { %v1231_v26 = vadd.f32 %v1230_v7, %v1229_v48  ;;  %v1244_v38 = vrot.slane %v1243_v10, 1  ;;  %v1302_v45 = vsel %vm914_vm4, %v3983_v9, 0.0  ;;  %3266 = vrcp.f32 %v1217_v50 }
 0x2ae   :  { %v3987_v58 = vpop.eup %3248  ;;  %v1251_v11 = vrot.slane %v1250_v36, 1  ;;  %v1263_v37 = vrot.slane %v1262_v57, 2  ;;  %v1283_v25 = vadd.f32 %v1282_v32, %v1281_v29  ;;  %3268 = vrcp.f32 %v3957_v49 }
 0x2af   :  { %v1277_v1 = vrot.slane %v1276_v40, 2  ;;  %v1290_v63 = vadd.f32 %v1289_v42, %v1288_v41  ;;  %v1295_v54 = vsel %vm914_vm4, %v3987_v58, 0.0  ;;  %v1326_v48 = vmul.f32 %v3890_v33, %v3800_v34 }
 0x2b0   :  { %v3251_v5 = vpop.eup %3250  ;;  %v1258_v51 = vrot.slane %v1257_v27, 1  ;;  %v1271_v0 = vadd.f32 %v1270_v24, %v1269_v61  ;;  %v1303_v55 = vrot.slane %v1302_v45, 4  ;;  %v1296_v46 = vrot.slane %v1295_v54, 4 }
 0x2b1   :  { %v3994_v47 = vpop.eup %3252  ;;  %v1245_v50 = vadd.f32 %v1244_v38, %v1243_v10  ;;  %v1284_v31 = vrot.slane %v1283_v25, 2  ;;  %v1324_v7 = vmul.f32 %v3251_v5, %v3804_v14  ;;  %3270 = vrcp.f32 %v1231_v26 }
 0x2b2   :  { %v3255_v49 = vpop.eup %3254  ;;  %v1264_v17 = vadd.f32 %v1263_v37, %v1262_v57  ;;  %v1297_v13 = vadd.f32 %v1296_v46, %v1295_v54  ;;  %v1316_v41 = vsel %vm914_vm4, %v3994_v47, 0.0  ;;  %3272 = vrcp.f32 %v1224_v60 }
 0x2b3   :  { %v3257_v34 = vpop.eup %3256  ;;  %v1278_v33 = vadd.f32 %v1277_v1, %v1276_v40  ;;  %v1291_v42 = vrot.slane %v1290_v63, 2  ;;  %3031 = vmatprep.mubr.msk.f32.mxu0 %vm914_vm4, %v1324_v7  ;;  %v1328_v61 = vmul.f32 %v3255_v49, %v3811_v53  ;;  %v1259_v10 = vadd.f32 %v1258_v51, %v1257_v27 }
 0x2b4   :  { %v3259_v29 = vpop.eup %3258  ;;  %v1272_v24 = vrot.slane %v1271_v0, 1  ;;  %v1304_v32 = vadd.f32 %v1303_v55, %v1302_v45  ;;  %v1317_v14 = vrot.slane %v1316_v41, 4  ;;  %3032 = vmatmul.mubr.msk.f32.vlgmr.msra.gmra.mxu0 %vm914_vm4, %v1326_v48  ;;  %v1285_v57 = vadd.f32 %v1284_v31, %v1283_v25 }
 0x2b5   :  { %v1298_v26 = vrot.slane %v1297_v13, 2  ;;  %3034 = vmatprep.mubr.msk.f32.mxu0 %vm914_vm4, %v1328_v61  ;;  %v1332_v60 = vmul.f32 %v3259_v29, %v3824_v3  ;;  %3274 = vrcp.f32 %v1245_v50  ;;  %v1252_v38 = vadd.f32 %v1251_v11, %v1250_v36 }
 0x2b6   :  { %v3261_v40 = vpop.eup %3260  ;;  %v1265_v37 = vrot.slane %v1264_v17, 1  ;;  %v1330_v1 = vmul.f32 %v3257_v34, %v3808_v44  ;;  %3276 = vrcp.f32 %v1238_v8  ;;  %v1279_v27 = vrot.slane %v1278_v33, 1 }
 0x2b7   :  { %v3263_v53 = vpop.eup %3262  ;;  %v1292_v54 = vadd.f32 %v1291_v42, %v1290_v63  ;;  %v1273_v5 = vadd.f32 %v1272_v24, %v1271_v0  ;;  %v1305_v48 = vrot.slane %v1304_v32, 2  ;;  %v1318_v25 = vadd.f32 %v1317_v14, %v1316_v41 }
 0x2b8   :  { %v4005_v45 = vpop.eup %3264  ;;  %3035 = vmatmul.mubr.msk.f32.gmra.mxu0 %vm914_vm4, %v1330_v1  ;;  %3278 = vrcp.f32 %v1259_v10  ;;  %v1286_v51 = vrot.slane %v1285_v57, 1  ;;  %v1299_v3 = vadd.f32 %v1298_v26, %v1297_v13  ;;  %v1336_v44 = vmul.f32 %v3261_v40, %v3839_v12 }
 0x2b9   :  { %v1309_v36 = vsel %vm914_vm4, %v4005_v45, 0.0  ;;  %3037 = vmatprep.mubr.msk.f32.mxu0 %vm914_vm4, %v1332_v60  ;;  %v1266_v11 = vadd.f32 %v1265_v37, %v1264_v17  ;;  %v1334_v55 = vmul.f32 %v3263_v53, %v3817_v59  ;;  %3280 = vrcp.f32 %v1252_v38 }
 0x2ba   :  { %v3267_v8 = vpop.eup %3266  ;;  %v1310_v63 = vrot.slane %v1309_v36, 4  ;;  %v1293_v46 = vrot.slane %v1292_v54, 1  ;;  %v1280_v50 = vadd.f32 %v1279_v27, %v1278_v33  ;;  %v1306_v31 = vadd.f32 %v1305_v48, %v1304_v32 }
 0x2bb   :  { %v3269_v0 = vpop.eup %3268  ;;  %v1319_v7 = vrot.slane %v1318_v25, 2  ;;  %v1287_v13 = vadd.f32 %v1286_v51, %v1285_v57  ;;  %v1300_v41 = vrot.slane %v1299_v3, 1  ;;  %v1340_v12 = vmul.f32 %v3267_v8, %v3866_v39 }
 0x2bc   :  { %v1311_v49 = vadd.f32 %v1310_v63, %v1309_v36  ;;  %3038 = vmatmul.mubr.msk.f32.gmra.mxu0 %vm914_vm4, %v1334_v55  ;;  %3282 = vrcp.f32 %v1273_v5  ;;  %v1338_v59 = vmul.f32 %v3269_v0, %v3828_v15  ;;  %v1294_v61 = vadd.f32 %v1293_v46, %v1292_v54  ;;  %v4054_v63 = vld [vmem:[#allocation5 + $0x8] sm:$0xff]   ;;  %v1633_v55 = vpop.permute.xlu0 %1632 }
 0x2bd   :  { %3040 = vmatprep.mubr.msk.f32.mxu0 %vm914_vm4, %v1336_v44  ;;  %3284 = vrcp.f32 %v1266_v11  ;;  %v1307_v33 = vrot.slane %v1306_v31, 1  ;;  %v1320_v29 = vadd.f32 %v1319_v7, %v1318_v25  ;;  %v1301_v24 = vadd.f32 %v1300_v41, %v1299_v3 }
 0x2be   :  { %v3271_v17 = vpop.eup %3270  ;;  %v1312_v34 = vrot.slane %v1311_v49, 2  ;;  %3286 = vrcp.f32 %v1280_v50 }
 0x2bf   :  { %v3273_v42 = vpop.eup %3272  ;;  %v1344_v32 = vmul.f32 %v3271_v17, %v3906_v62  ;;  %3288 = vrcp.f32 %v1287_v13  ;;  %v1308_v26 = vadd.f32 %v1307_v33, %v1306_v31  ;;  %v1321_v60 = vrot.slane %v1320_v29, 1 }
 0x2c0   :  { %v1313_v10 = vadd.f32 %v1312_v34, %v1311_v49  ;;  %3041 = vmatmul.mubr.msk.f32.gmra.mxu0 %vm914_vm4, %v1338_v59  ;;  %v1342_v57 = vmul.f32 %v3273_v42, %v3854_v18  ;;  %3290 = vrcp.f32 %v1294_v61 }
 0x2c1   :  { %3043 = vmatprep.mubr.msk.f32.mxu0 %vm914_vm4, %v1340_v12  ;;  %3292 = vrcp.f32 %v1301_v24  ;;  %v1322_v53 = vadd.f32 %v1321_v60, %v1320_v29 }
 0x2c2   :  { %v3275_v39 = vpop.eup %3274  ;;  %v1314_v14 = vrot.slane %v1313_v10, 1  ;;  %3294 = vrcp.f32 %v1308_v26 }
 0x2c3   :  { %v3277_v15 = vpop.eup %3276  ;;  %v1348_v37 = vmul.f32 %v3275_v39, %v3929_v2 }
 0x2c4   :  { %3044 = vmatmul.mubr.msk.f32.gmra.mxu0 %vm914_vm4, %v1342_v57  ;;  %v1315_v38 = vadd.f32 %v1314_v14, %v1313_v10  ;;  %v1346_v62 = vmul.f32 %v3277_v15, %v3882_v28 }
 0x2c5   :  { %v3279_v40 = vpop.eup %3278  ;;  %3046 = vmatprep.mubr.msk.f32.mxu0 %vm914_vm4, %v1344_v32 }
 0x2c6   :  { %v3281_v1 = vpop.eup %3280  ;;  %v1352_v18 = vmul.f32 %v3279_v40, %v3940_v21  ;;  %3296 = vrcp.f32 %v1315_v38 }
 0x2c7   :  { %v1350_v54 = vmul.f32 %v3281_v1, %v3921_v43  ;;  %3298 = vrcp.f32 %v1322_v53 }
 0x2c8   :  { %3047 = vmatmul.mubr.msk.f32.gmra.mxu0 %vm914_vm4, %v1346_v62 }
 0x2c9   :  { %3049 = vmatprep.mubr.msk.f32.mxu0 %vm914_vm4, %v1348_v37  ;;  %v3283_v27 = vpop.eup %3282 }
 0x2ca   :  { %v3285_v5 = vpop.eup %3284  ;;  %v1356_v28 = vmul.f32 %v3283_v27, %v3966_v56 }
 0x2cb   :  { %v3287_v2 = vpop.eup %3286  ;;  %v1354_v25 = vmul.f32 %v3285_v5, %v3948_v16 }
 0x2cc   :  { %3050 = vmatmul.mubr.msk.f32.gmra.mxu0 %vm914_vm4, %v1350_v54  ;;  %v3289_v48 = vpop.eup %3288  ;;  %v1358_v21 = vmul.f32 %v3287_v2, %v3952_v30 }
 0x2cd   :  { %3052 = vmatprep.mubr.msk.f32.mxu0 %vm914_vm4, %v1352_v18  ;;  %v3291_v51 = vpop.eup %3290  ;;  %v1360_v43 = vmul.f32 %v3289_v48, %v3976_v35 }
 0x2ce   :  { %v3293_v3 = vpop.eup %3292  ;;  %v1362_v36 = vmul.f32 %v3291_v51, %v3974_v19  ;;  %v4294_v19 = vmov 0.0  }
 0x2cf   :  { %v3295_v44 = vpop.eup %3294  ;;  %v1364_v56 = vmul.f32 %v3293_v3, %v3987_v58  ;;  %v3194_v58 = vld [vmem:[#allocation11 + $0x18] sm:$0xff]  }
 0x2d0   :  { %3053 = vmatmul.mubr.msk.f32.gmra.mxu0 %vm914_vm4, %v1354_v25  ;;  %v1366_v30 = vmul.f32 %v3295_v44, %v3983_v9  ;;  %v3196_v9 = vld [vmem:[#allocation11 + $0x8] sm:$0xff]  }
 0x2d1   :  { %3055 = vmatprep.mubr.msk.f32.mxu0 %vm914_vm4, %v1356_v28  ;;  %3076 = vmatpush3.bf16.msra.mxu0 %v3194_v58 }
 0x2d2   :  { %3077 = vmatprep.subr.bf16.mxu0 %v4294_v19  ;;  %3068 = vmatpush3.bf16.msra.mxu1 %v3196_v9 }
 0x2d3   :  { %v3297_v16 = vpop.eup %3296  ;;  %3069 = vmatprep.subr.bf16.mxu1 %v4294_v19 }
 0x2d4   :  { %3056 = vmatmul.mubr.msk.f32.gmra.mxu0 %vm914_vm4, %v1358_v21  ;;  %v3299_v8 = vpop.eup %3298  ;;  %v1368_v35 = vmul.f32 %v3297_v16, %v4005_v45  ;;  %v3197_v45 = vld [vmem:[#allocation11] sm:$0xff]  }
 0x2d5   :  { %3058 = vmatprep.mubr.msk.f32.mxu0 %vm914_vm4, %v1360_v43  ;;  %v1370_v11 = vmul.f32 %v3299_v8, %v3994_v47  ;;  %v3195_v47 = vld [vmem:[#allocation11 + $0x10] sm:$0xff]  }
 0x2d6   :  { %3070 = vmatpush3.bf16.msra.mxu1 %v3197_v45  ;;  %3078 = vmatpush3.bf16.msra.mxu0 %v3195_v47 }
 0x2d7   :  { %3083 = vmatprep.subr.bf16.mxu1 %v4294_v19  ;;  %3091 = vmatprep.subr.bf16.mxu0 %v4054_v63 }
 0x2d8   :  { %3059 = vmatmul.mubr.msk.f32.gmra.mxu0 %vm914_vm4, %v1362_v36 }
 0x2d9   :  { %3061 = vmatprep.mubr.msk.f32.mxu0 %vm914_vm4, %v1364_v56 }
 0x2dc   :  { %3062 = vmatmul.mubr.msk.f32.gmra.mxu0 %vm914_vm4, %v1366_v30 }
 0x2dd   :  { %3064 = vmatprep.mubr.msk.f32.mxu0 %vm914_vm4, %v1368_v35 }
 0x2e0   :  { %3065 = vmatmul.mubr.msk.f32.gmra.mxu0 %vm914_vm4, %v1370_v11 }
 0x2e1   :  { %3079 = vmatprep.mubr.msk.bf16.mxu0 %vm3484_vm0, %v4294_v19 }
 0x374   :  { %v3033_v0 = vpop.f32.mrf.mxu0 }
 0x375   :  { %v1642_v46 = vmul.f32 %v3033_v0, %v1633_v55 }
 0x376   :  { %v1513_v50 = vpop.f32.mrf.mxu0 }
 0x377   :  { %v1672_v31 = vsel %vm200_vm1, %v1642_v46, 0.0  ;;  %v1641_v7 = vmul.f32 %v1633_v55, %v1513_v50 }
 0x378   :  { %v1673_v49 = vrot.slane %v1672_v31, 4  ;;  %v3036_v13 = vpop.f32.mrf.mxu0 }
 0x379   :  { %v1665_v41 = vsel %vm200_vm1, %v1641_v7, 0.0  ;;  %v1644_v12 = vmul.f32 %v3036_v13, %v1633_v55 }
 0x37a   :  { %v1674_v17 = vadd.f32 %v1673_v49, %v1672_v31  ;;  %v1666_v34 = vrot.slane %v1665_v41, 4  ;;  %v1523_v59 = vpop.f32.mrf.mxu0  ;;  %v4065_v31 = vpop.permute.xlu1 %1634 }
 0x37b   :  { %v1686_v42 = vsel %vm200_vm1, %v1644_v12, 0.0  ;;  %v1643_v61 = vmul.f32 %v1633_v55, %v1523_v59 }
 0x37c   :  { %v1675_v33 = vrot.slane %v1674_v17, 2  ;;  %v1667_v29 = vadd.f32 %v1666_v34, %v1665_v41  ;;  %v1687_v10 = vrot.slane %v1686_v42, 4  ;;  %v3039_v24 = vpop.f32.mrf.mxu0 }
 0x37d   :  { %v1679_v32 = vsel %vm200_vm1, %v1643_v61, 0.0  ;;  %v1646_v39 = vmul.f32 %v3039_v24, %v1633_v55 }
 0x37e   :  { %v1676_v14 = vadd.f32 %v1675_v33, %v1674_v17  ;;  %v1668_v57 = vrot.slane %v1667_v29, 2  ;;  %v1688_v15 = vadd.f32 %v1687_v10, %v1686_v42  ;;  %v1680_v26 = vrot.slane %v1679_v32, 4  ;;  %v1533_v60 = vpop.f32.mrf.mxu0 }
 0x37f   :  { %v1700_v40 = vsel %vm200_vm1, %v1646_v39, 0.0  ;;  %v1645_v38 = vmul.f32 %v1633_v55, %v1533_v60 }
 0x380   :  { %v1677_v37 = vrot.slane %v1676_v14, 1  ;;  %v1669_v62 = vadd.f32 %v1668_v57, %v1667_v29  ;;  %v1689_v1 = vrot.slane %v1688_v15, 2  ;;  %v1681_v53 = vadd.f32 %v1680_v26, %v1679_v32  ;;  %v3042_v18 = vpop.f32.mrf.mxu0 }
 0x381   :  { %v1701_v27 = vrot.slane %v1700_v40, 4  ;;  %v1693_v54 = vsel %vm200_vm1, %v1645_v38, 0.0  ;;  %v1648_v5 = vmul.f32 %v3042_v18, %v1633_v55 }
 0x382   :  { %v1678_v2 = vadd.f32 %v1677_v37, %v1676_v14  ;;  %v1670_v28 = vrot.slane %v1669_v62, 1  ;;  %v1690_v48 = vadd.f32 %v1689_v1, %v1688_v15  ;;  %v1682_v25 = vrot.slane %v1681_v53, 2  ;;  %v1543_v21 = vpop.f32.mrf.mxu0 }
 0x383   :  { %v1702_v51 = vadd.f32 %v1701_v27, %v1700_v40  ;;  %v1694_v43 = vrot.slane %v1693_v54, 4  ;;  %v1714_v3 = vsel %vm200_vm1, %v1648_v5, 0.0  ;;  %v1647_v36 = vmul.f32 %v1633_v55, %v1543_v21 }
 0x384   :  { %v1834_v44 = vpack.c.bf16 %v1678_v2, %v1678_v2  ;;  %v1671_v56 = vadd.f32 %v1670_v28, %v1669_v62  ;;  %v1691_v16 = vrot.slane %v1690_v48, 1  ;;  %v1683_v30 = vadd.f32 %v1682_v25, %v1681_v53  ;;  %v3045_v8 = vpop.f32.mrf.mxu0 }
 0x385   :  { %v1703_v35 = vrot.slane %v1702_v51, 2  ;;  %v1695_v11 = vadd.f32 %v1694_v43, %v1693_v54  ;;  %v1715_v58 = vrot.slane %v1714_v3, 4  ;;  %v1707_v9 = vsel %vm200_vm1, %v1647_v36, 0.0 }
 0x386   :  { %v1899_v45 = vunpack.c.l.b16 %v1834_v44  ;;  %v1833_v47 = vpack.c.bf16 %v1671_v56, %v1671_v56  ;;  %v1692_v0 = vadd.f32 %v1691_v16, %v1690_v48  ;;  %v1684_v46 = vrot.slane %v1683_v30, 1  ;;  %v1553_v50 = vpop.f32.mrf.mxu0 }
 0x387   :  { %v1704_v7 = vadd.f32 %v1703_v35, %v1702_v51  ;;  %v1696_v55 = vrot.slane %v1695_v11, 2  ;;  %v1716_v49 = vadd.f32 %v1715_v58, %v1714_v3  ;;  %v1708_v13 = vrot.slane %v1707_v9, 4 }
 0x388   :  { %v1898_v41 = vunpack.c.l.b16 %v1833_v47  ;;  %v1836_v12 = vpack.c.bf16 %v1692_v0, %v1692_v0  ;;  %v1685_v17 = vadd.f32 %v1684_v46, %v1683_v30  ;;  %v1650_v34 = vmul.f32 %v3045_v8, %v4065_v31  ;;  %v3048_v59 = vpop.f32.mrf.mxu0 }
 0x389   :  { %v1705_v42 = vrot.slane %v1704_v7, 1  ;;  %v1697_v61 = vadd.f32 %v1696_v55, %v1695_v11  ;;  %v1717_v33 = vrot.slane %v1716_v49, 2  ;;  %v1709_v29 = vadd.f32 %v1708_v13, %v1707_v9 }
 0x38a   :  { %v1907_v10 = vsel %vm1906_vm5, %v1899_v45, %v1898_v41  ;;  %v1901_v24 = vunpack.c.l.b16 %v1836_v12  ;;  %v1835_v32 = vpack.c.bf16 %v1685_v17, %v1685_v17  ;;  %v1728_v39 = vsel %vm200_vm1, %v1650_v34, 0.0  ;;  %v1563_v14 = vpop.f32.mrf.mxu0 }
 0x38b   :  { %v1706_v57 = vadd.f32 %v1705_v42, %v1704_v7  ;;  %v1698_v15 = vrot.slane %v1697_v61, 1  ;;  %v1718_v26 = vadd.f32 %v1717_v33, %v1716_v49  ;;  %v1710_v60 = vrot.slane %v1709_v29, 2 }
 0x38c   :  { %v1900_v40 = vunpack.c.l.b16 %v1835_v32  ;;  %v1729_v38 = vrot.slane %v1728_v39, 4  ;;  %v1649_v37 = vmul.f32 %v4065_v31, %v1553_v50  ;;  %v1652_v62 = vmul.f32 %v3048_v59, %v4065_v31  ;;  %v3051_v1 = vpop.f32.mrf.mxu0 }
 0x38d   :  { %v1838_v53 = vpack.c.bf16 %v1706_v57, %v1706_v57  ;;  %v1699_v18 = vadd.f32 %v1698_v15, %v1697_v61  ;;  %v1719_v27 = vrot.slane %v1718_v26, 1  ;;  %v1711_v54 = vadd.f32 %v1710_v60, %v1709_v29 }
 0x38e   :  { %v1909_v5 = vsel %vm1908_vm6, %v1900_v40, %v1907_v10  ;;  %v1730_v2 = vadd.f32 %v1729_v38, %v1728_v39  ;;  %v1721_v28 = vsel %vm200_vm1, %v1649_v37, 0.0  ;;  %v1742_v48 = vsel %vm200_vm1, %v1652_v62, 0.0  ;;  %v1573_v25 = vpop.f32.mrf.mxu0 }
 0x38f   :  { %v1903_v21 = vunpack.c.l.b16 %v1838_v53  ;;  %v1837_v51 = vpack.c.bf16 %v1699_v18, %v1699_v18  ;;  %v1911_v43 = vsel %vm1910_vm7, %v1901_v24, %v1909_v5  ;;  %v1720_v3 = vadd.f32 %v1719_v27, %v1718_v26  ;;  %v3200_v27 = vld [vmem:[#allocation11 + $0x28] sm:$0xff]  }
 0x390   :  { %v1712_v36 = vrot.slane %v1711_v54, 1  ;;  %v1731_v44 = vrot.slane %v1730_v2, 2  ;;  %v1722_v56 = vrot.slane %v1721_v28, 4  ;;  %v1743_v16 = vrot.slane %v1742_v48, 4  ;;  %v3054_v30 = vpop.f32.mrf.mxu0 }
 0x391   :  { %v1902_v8 = vunpack.c.l.b16 %v1837_v51  ;;  %v1840_v35 = vpack.c.bf16 %v1720_v3, %v1720_v3  ;;  %v1651_v11 = vmul.f32 %v4065_v31, %v1563_v14  ;;  %v1654_v58 = vmul.f32 %v3051_v1, %v4065_v31 }
 0x392   :  { %v1713_v9 = vadd.f32 %v1712_v36, %v1711_v54  ;;  %v1732_v45 = vadd.f32 %v1731_v44, %v1730_v2  ;;  %v1723_v47 = vadd.f32 %v1722_v56, %v1721_v28  ;;  %v1744_v0 = vadd.f32 %v1743_v16, %v1742_v48  ;;  %v1583_v46 = vpop.f32.mrf.mxu0 }
 0x393   :  { %v1913_v50 = vsel %vm1912_vm11, %v1902_v8, %v1911_v43  ;;  %v1905_v7 = vunpack.c.l.b16 %v1840_v35  ;;  %v1735_v55 = vsel %vm200_vm1, %v1651_v11, 0.0  ;;  %v1756_v49 = vsel %vm200_vm1, %v1654_v58, 0.0  ;;  %v4088_v43 = vpop.permute.xlu1 %1636  ;;  %v3201_v58 = vld [vmem:[#allocation11 + $0x20] sm:$0xff]  }
 0x394   :  { %v1839_v13 = vpack.c.bf16 %v1713_v9, %v1713_v9  ;;  %v1915_v41 = vsel %vm1914_vm12, %v1903_v21, %v1913_v50  ;;  %v1733_v12 = vrot.slane %v1732_v45, 1  ;;  %v1724_v17 = vrot.slane %v1723_v47, 2  ;;  %v3057_v34 = vpop.f32.mrf.mxu0 }
 0x395   :  { %v1745_v59 = vrot.slane %v1744_v0, 2  ;;  %v1736_v42 = vrot.slane %v1735_v55, 4  ;;  %v1757_v61 = vrot.slane %v1756_v49, 4  ;;  %v1653_v33 = vmul.f32 %v4065_v31, %v1573_v25 }
 0x396   :  { %v1904_v29 = vunpack.c.l.b16 %v1839_v13  ;;  %v1734_v10 = vadd.f32 %v1733_v12, %v1732_v45  ;;  %v1725_v24 = vadd.f32 %v1724_v17, %v1723_v47  ;;  %v1656_v32 = vmul.f32 %v3054_v30, %v4065_v31  ;;  %v1593_v39 = vpop.f32.mrf.mxu0 }
 0x397   :  { %v1746_v14 = vadd.f32 %v1745_v59, %v1744_v0  ;;  %v1737_v57 = vadd.f32 %v1736_v42, %v1735_v55  ;;  %v1758_v15 = vadd.f32 %v1757_v61, %v1756_v49  ;;  %v1749_v26 = vsel %vm200_vm1, %v1653_v33, 0.0 }
 0x398   :  { %v1917_v60 = vsel %vm1916_vm14, %v1904_v29, %v1915_v41  ;;  %v1726_v40 = vrot.slane %v1725_v24, 1  ;;  %v1750_v38 = vrot.slane %v1749_v26, 4  ;;  %v3060_v18 = vpop.f32.mrf.mxu0  ;;  %v1842_v5 = vpack.c.bf16 %v1734_v10, %v1734_v10 }
 0x399   :  { %v1919_v37 = vsel %vm1918_vm15, %v1905_v7, %v1917_v60  ;;  %v1747_v62 = vrot.slane %v1746_v14, 1  ;;  %v1738_v1 = vrot.slane %v1737_v57, 2  ;;  %v1759_v53 = vrot.slane %v1758_v15, 2 }
 0x39a   :  { %v1920_v54 = vpack.c.b16 %v1919_v37, %v1919_v37  ;;  %v1727_v2 = vadd.f32 %v1726_v40, %v1725_v24  ;;  %v1751_v28 = vadd.f32 %v1750_v38, %v1749_v26  ;;  %v1770_v51 = vsel %vm200_vm1, %v1656_v32, 0.0  ;;  %v1603_v11 = vpop.f32.mrf.mxu0 }
 0x39b   :  { %v1748_v48 = vadd.f32 %v1747_v62, %v1746_v14  ;;  %v1739_v25 = vadd.f32 %v1738_v1, %v1737_v57  ;;  %v1760_v21 = vadd.f32 %v1759_v53, %v1758_v15  ;;  %v1771_v44 = vrot.slane %v1770_v51, 4 }
 0x39c   :  { %v1841_v3 = vpack.c.bf16 %v1727_v2, %v1727_v2  ;;  %v1752_v36 = vrot.slane %v1751_v28, 2  ;;  %v1655_v56 = vmul.f32 %v4065_v31, %v1583_v46  ;;  %3072 = vmatmul.mubr.msk.bf16.vlgmr.msra.gmra.mxu1 %vm200_vm1, %v1920_v54  ;;  %v1658_v35 = vmul.f32 %v3057_v34, %v4088_v43  ;;  %v3063_v42 = vpop.f32.mrf.mxu0 }
 0x39d   :  { %v1844_v16 = vpack.c.bf16 %v1748_v48, %v1748_v48  ;;  %v1740_v30 = vrot.slane %v1739_v25, 1  ;;  %v1761_v8 = vrot.slane %v1760_v21, 1  ;;  %3084 = vmatpush3.bf16.msra.mxu1 %v3200_v27  ;;  %3087 = vmatprep.mubr.msk.bf16.mxu1 %vm3484_vm0, %v4294_v19  ;;  %v1772_v47 = vadd.f32 %v1771_v44, %v1770_v51 }
 0x39e   :  { %v1984_v9 = vunpack.c.l.b16 %v1841_v3  ;;  %v1753_v45 = vadd.f32 %v1752_v36, %v1751_v28  ;;  %v1763_v0 = vsel %vm200_vm1, %v1655_v56, 0.0  ;;  %3085 = vmatprep.subr.bf16.mxu1 %v4294_v19  ;;  %v1985_v31 = vunpack.c.l.b16 %v1842_v5 }
 0x39f   :  { %v1741_v46 = vadd.f32 %v1740_v30, %v1739_v25  ;;  %v1762_v50 = vadd.f32 %v1761_v8, %v1760_v21  ;;  %v1764_v7 = vrot.slane %v1763_v0, 4  ;;  %v1987_v55 = vunpack.c.l.b16 %v1844_v16 }
 0x3a0   :  { %v1754_v49 = vrot.slane %v1753_v45, 1  ;;  %v1773_v13 = vrot.slane %v1772_v47, 2  ;;  %v1784_v41 = vsel %vm200_vm1, %v1658_v35, 0.0  ;;  %v1992_v12 = vsel %vm1906_vm5, %v1985_v31, %v1984_v9 }
 0x3a1   :  { %v1843_v17 = vpack.c.bf16 %v1741_v46, %v1741_v46  ;;  %v1765_v34 = vadd.f32 %v1764_v7, %v1763_v0  ;;  %v1785_v59 = vrot.slane %v1784_v41, 4  ;;  %3086 = vmatpush3.bf16.msra.mxu1 %v3201_v58  ;;  %v1657_v29 = vmul.f32 %v4088_v43, %v1593_v39  ;;  %v1613_v39 = vpop.f32.mrf.mxu0 }
 0x3a2   :  { %v1755_v61 = vadd.f32 %v1754_v49, %v1753_v45  ;;  %v1774_v33 = vadd.f32 %v1773_v13, %v1772_v47  ;;  %v1660_v10 = vmul.f32 %v3060_v18, %v4088_v43  ;;  %3099 = vmatprep.subr.mxu1 %v4294_v19  ;;  %v1846_v32 = vpack.c.bf16 %v1762_v50, %v1762_v50 }
 0x3a3   :  { %v1986_v24 = vunpack.c.l.b16 %v1843_v17  ;;  %v1766_v14 = vrot.slane %v1765_v34, 2  ;;  %v1786_v57 = vadd.f32 %v1785_v59, %v1784_v41  ;;  %v1777_v60 = vsel %vm200_vm1, %v1657_v29, 0.0  ;;  %v3066_v16 = vpop.f32.mrf.mxu0 }
 0x3a4   :  { %v1845_v15 = vpack.c.bf16 %v1755_v61, %v1755_v61  ;;  %v1775_v26 = vrot.slane %v1774_v33, 1  ;;  %v1798_v40 = vsel %vm200_vm1, %v1660_v10, 0.0  ;;  %v1778_v1 = vrot.slane %v1777_v60, 4 }
 0x3a5   :  { %v1993_v38 = vsel %vm1908_vm6, %v1986_v24, %v1992_v12  ;;  %v1767_v37 = vadd.f32 %v1766_v14, %v1765_v34  ;;  %v1787_v62 = vrot.slane %v1786_v57, 2  ;;  %v1799_v27 = vrot.slane %v1798_v40, 4 }
 0x3a6   :  { %v1988_v53 = vunpack.c.l.b16 %v1845_v15  ;;  %v1776_v18 = vadd.f32 %v1775_v26, %v1774_v33  ;;  %v1994_v54 = vsel %vm1910_vm7, %v1987_v55, %v1993_v38  ;;  %v1779_v2 = vadd.f32 %v1778_v1, %v1777_v60  ;;  %v3199_v15 = vld [vmem:[#allocation5] sm:$0xff]  }
 0x3a7   :  { %v1768_v5 = vrot.slane %v1767_v37, 1  ;;  %v1659_v28 = vmul.f32 %v4088_v43, %v1603_v11  ;;  %v1788_v25 = vadd.f32 %v1787_v62, %v1786_v57  ;;  %v1800_v21 = vadd.f32 %v1799_v27, %v1798_v40 }
 0x3a8   :  { %v1995_v48 = vsel %vm1912_vm11, %v1988_v53, %v1994_v54  ;;  %v1662_v51 = vmul.f32 %v3063_v42, %v4088_v43  ;;  %v1989_v3 = vunpack.c.l.b16 %v1846_v32  ;;  %v1848_v36 = vpack.c.bf16 %v1776_v18, %v1776_v18  ;;  %v1623_v42 = vpop.f32.mrf.mxu0 }
 0x3a9   :  { %v1769_v44 = vadd.f32 %v1768_v5, %v1767_v37  ;;  %v1780_v56 = vrot.slane %v1779_v2, 2  ;;  %v1801_v30 = vrot.slane %v1800_v21, 2  ;;  %v1791_v8 = vsel %vm200_vm1, %v1659_v28, 0.0 }
 0x3aa   :  { %v1812_v35 = vsel %vm200_vm1, %v1662_v51, 0.0  ;;  %v1996_v9 = vsel %vm1914_vm12, %v1989_v3, %v1995_v48  ;;  %v1792_v45 = vrot.slane %v1791_v8, 4  ;;  %v1789_v47 = vrot.slane %v1788_v25, 1 }
 0x3ab   :  { %v1847_v58 = vpack.c.bf16 %v1769_v44, %v1769_v44  ;;  %v1781_v11 = vadd.f32 %v1780_v56, %v1779_v2  ;;  %v1813_v0 = vrot.slane %v1812_v35, 4  ;;  %v1661_v31 = vmul.f32 %v4088_v43, %v1613_v39 }
 0x3ac   :  { %v1664_v46 = vmul.f32 %v3066_v16, %v4088_v43  ;;  %v1991_v50 = vunpack.c.l.b16 %v1848_v36  ;;  %v1793_v49 = vadd.f32 %v1792_v45, %v1791_v8  ;;  %v1802_v13 = vadd.f32 %v1801_v30, %v1800_v21 }
 0x3ad   :  { %v1990_v7 = vunpack.c.l.b16 %v1847_v58  ;;  %v1782_v55 = vrot.slane %v1781_v11, 1  ;;  %v1814_v41 = vadd.f32 %v1813_v0, %v1812_v35  ;;  %v1805_v12 = vsel %vm200_vm1, %v1661_v31, 0.0 }
 0x3ae   :  { %v1826_v17 = vsel %vm200_vm1, %v1664_v46, 0.0  ;;  %v1794_v59 = vrot.slane %v1793_v49, 2  ;;  %v1806_v10 = vrot.slane %v1805_v12, 4  ;;  %v1790_v32 = vadd.f32 %v1789_v47, %v1788_v25  ;;  %v3324_v25 = vld [vmem:[#allocation2 + $0x8] sm:$0xf] }
 0x3af   :  { %v1997_v34 = vsel %vm1916_vm14, %v1990_v7, %v1996_v9  ;;  %v1783_v33 = vadd.f32 %v1782_v55, %v1781_v11  ;;  %v1815_v29 = vrot.slane %v1814_v41, 2  ;;  %v1827_v57 = vrot.slane %v1826_v17, 4 }
 0x3b0   :  { %v1998_v61 = vsel %vm1918_vm15, %v1991_v50, %v1997_v34  ;;  %v1795_v14 = vadd.f32 %v1794_v59, %v1793_v49  ;;  %v1803_v26 = vrot.slane %v1802_v13, 1  ;;  %v1807_v40 = vadd.f32 %v1806_v10, %v1805_v12 }
 0x3b1   :  { %v1999_v24 = vpack.c.b16 %v1998_v61, %v1998_v61  ;;  %v1816_v60 = vadd.f32 %v1815_v29, %v1814_v41  ;;  %v1663_v38 = vmul.f32 %v4088_v43, %v1623_v42  ;;  %v1828_v62 = vadd.f32 %v1827_v57, %v1826_v17 }
 0x3b2   :  { %v1796_v37 = vrot.slane %v1795_v14, 1  ;;  %v1849_v1 = vpack.c.bf16 %v1783_v33, %v1783_v33  ;;  %v1808_v39 = vrot.slane %v1807_v40, 2  ;;  %v4295_v18 = vcombine.low %v3580_v4, %v3582_v6 }
 0x3b3   :  { %3080 = vmatmul.mubr.msk.bf16.vlgmr.msra.gmra.mxu0 %vm200_vm1, %v1999_v24  ;;  %v1819_v53 = vsel %vm200_vm1, %v1663_v38, 0.0  ;;  %v1829_v54 = vrot.slane %v1828_v62, 2  ;;  %v1850_v43 = vpack.c.bf16 %v1790_v32, %v1790_v32  ;;  %v1804_v2 = vadd.f32 %v1803_v26, %v1802_v13 }
 0x3b4   :  { %3092 = vmatpush3.bf16.msra.mxu0 %v4054_v63  ;;  %3095 = vmatprep.mubr.msk.bf16.mxu0 %vm200_vm1, %v4295_v18  ;;  %v1797_v27 = vadd.f32 %v1796_v37, %v1795_v14  ;;  %v1820_v5 = vrot.slane %v1819_v53, 4  ;;  %v1817_v28 = vrot.slane %v1816_v60, 1  ;;  %v1809_v48 = vadd.f32 %v1808_v39, %v1807_v40 }
 0x3b5   :  { %3093 = vmatprep.subr.bf16.mxu0 %v3199_v15  ;;  %v2822_v21 = vcombine.low %v3324_v25, %v3324_v25  ;;  %v1830_v3 = vadd.f32 %v1829_v54, %v1828_v62  ;;  %v2063_v44 = vunpack.c.l.b16 %v1849_v1  ;;  %v2064_v16 = vunpack.c.l.b16 %v1850_v43 }
 0x3b6   :  { %v1851_v51 = vpack.c.bf16 %v1797_v27, %v1797_v27  ;;  %v1821_v36 = vadd.f32 %v1820_v5, %v1819_v53  ;;  %v1810_v63 = vrot.slane %v1809_v48, 1  ;;  %v1852_v30 = vpack.c.bf16 %v1804_v2, %v1804_v2 }
 0x3b7   :  { %v1831_v4 = vrot.slane %v1830_v3, 1  ;;  %v1818_v8 = vadd.f32 %v1817_v28, %v1816_v60  ;;  %v2071_v9 = vsel %vm1906_vm5, %v2064_v16, %v2063_v44  ;;  %v4296_v33 = vmov 1.0  }
 0x3b8   :  { %3094 = vmatpush3.bf16.msra.mxu0 %v3199_v15  ;;  %v2065_v56 = vunpack.c.l.b16 %v1851_v51  ;;  %v1822_v6 = vrot.slane %v1821_v36, 2  ;;  %v1811_v35 = vadd.f32 %v1810_v63, %v1809_v48  ;;  %v2066_v31 = vunpack.c.l.b16 %v1852_v30 }
 0x3b9   :  { %3134 = vmatprep.subr.mxu0 %v4294_v19  ;;  %v1832_v45 = vadd.f32 %v1831_v4, %v1830_v3  ;;  %v1854_v46 = vpack.c.bf16 %v1818_v8, %v1818_v8 }
 0x3ba   :  { %v1823_v58 = vadd.f32 %v1822_v6, %v1821_v36  ;;  %v1853_v11 = vpack.c.bf16 %v1811_v35, %v1811_v35  ;;  %v2072_v47 = vsel %vm1908_vm6, %v2065_v56, %v2071_v9 }
 0x3bb   :  { %3096 = vmatmul.mubr.msk.bf16.vlgmr.msra.gmra.mxu0 %vm200_vm1, %v2822_v21  ;;  %v2073_v55 = vsel %vm1910_vm7, %v2066_v31, %v2072_v47  ;;  %v1856_v49 = vpack.c.bf16 %v1832_v45, %v1832_v45  ;;  %v2068_v12 = vunpack.c.l.b16 %v1854_v46 }
 0x3bc   :  { %3135 = vmatpush3.msk.msra.mxu0 %vm1443_vm3, %v3749_v52  ;;  %3136 = vmatprep.mubr.msk.f32.mxu0 %vm3484_vm0, %v4294_v19  ;;  %v1824_v0 = vrot.slane %v1823_v58, 1  ;;  %v2067_v50 = vunpack.c.l.b16 %v1853_v11 }
 0x3bd   :  { %v2070_v34 = vunpack.c.l.b16 %v1856_v49 }
 0x3be   :  { %v1825_v7 = vadd.f32 %v1824_v0, %v1823_v58  ;;  %v2074_v13 = vsel %vm1912_vm11, %v2067_v50, %v2073_v55 }
 0x3bf   :  { %v2075_v52 = vsel %vm1914_vm12, %v2068_v12, %v2074_v13 }
 0x3c0   :  { %v1855_v41 = vpack.c.bf16 %v1825_v7, %v1825_v7 }
 0x3c2   :  { %v2069_v17 = vunpack.c.l.b16 %v1855_v41 }
 0x3c4   :  { %v2076_v59 = vsel %vm1916_vm14, %v2069_v17, %v2075_v52 }
 0x3c5   :  { %v2077_v42 = vsel %vm1918_vm15, %v2070_v34, %v2076_v59 }
 0x3c6   :  { %v2078_v61 = vpack.c.b16 %v2077_v42, %v2077_v42 }
 0x3c8   :  { %3088 = vmatmul.mubr.msk.bf16.vlgmr.msra.gmra.mxu1 %vm200_vm1, %v2078_v61 }
 0x3c9   :  { %3100 = vmatpush3.msk.msra.mxu1 %vm3605_vm8, %v4296_v33  ;;  %3107 = vmatprep.mubr.msk.f32.mxu1 %vm3484_vm0, %v4294_v19  ;;  %vm2718_vm8 = vcmask 785408  }
 0x3ca   :  { %3101 = vmatprep.subr.mxu1 %v4294_v19 }
 0x3cb   :  { %3102 = vmatpush3.msk.msra.mxu1 %vm3612_vm9, %v4296_v33 }
 0x3cc   :  { %3103 = vmatprep.subr.mxu1 %v4294_v19 }
 0x3cd   :  { %3104 = vmatpush3.msk.msra.mxu1 %vm3619_vm10, %v4296_v33 }
 0x3ce   :  { %3105 = vmatprep.subr.mxu1 %v4294_v19 }
 0x3cf   :  { %3106 = vmatpush3.msk.msra.mxu1 %vm3637_vm13, %v4296_v33 }
 0x45c   :  { %v4157_v29 = vpop.f32.mrf.mxu1 }
 0x45e   :  { %v3073_v10 = vpop.f32.mrf.mxu1 }
 0x460   :  { %v1973_v24 = vpop.f32.mrf.mxu1 }
 0x462   :  { %v3074_v32 = vpop.f32.mrf.mxu1 }
 0x473   :  { %v4159_v14 = vpop.f32.mrf.mxu0 }
 0x475   :  { %v3081_v22 = vpop.f32.mrf.mxu0 }
 0x477   :  { %v2052_v57 = vpop.f32.mrf.mxu0 }
 0x479   :  { %v3082_v15 = vpop.f32.mrf.mxu0 }
 0x47b   :  { %v3097_v26 = vpop.f32.mrf.mxu0 }
 0x47c   :  { %v2214_v62 = vadd.f32 %v3097_v26, %v2820_v23 }
 0x47d   :  { %v2205_v60 = vpop.f32.mrf.mxu0 }
 0x47e   :  { %v2206_v40 = vadd.f32 %v2820_v23, %v2205_v60 }
 0x47f   :  { %v3098_v38 = vpop.f32.mrf.mxu0 }
 0x480   :  { %2222 = vrot.lane.b32.xlu0 %v2206_v40, %s3486_s20 }
 0x481   :  { %v2208_v37 = vpop.f32.mrf.mxu0 }
 0x482   :  { %v2209_v1 = vadd.f32 %v2820_v23, %v2208_v37 }
 0x484   :  { %2224 = vrot.lane.b32.xlu1 %v2209_v1, %s3486_s20  ;;  %2226 = vrot.lane.b32.xlu0 %v2214_v62, %s3486_s20 }
 0x488   :  { %2583 = vrot.lane.b32.xlu1 %v2206_v40, %s3477_s14  ;;  %2585 = vrot.lane.b32.xlu0 %v2209_v1, %s3477_s14  ;;  %v4169_v39 = vpop.f32.mrf.mxu1 }
 0x48a   :  { %v3089_v53 = vpop.f32.mrf.mxu1 }
 0x48c   :  { %2587 = vrot.lane.b32.xlu1 %v2214_v62, %s3477_s14  ;;  %v2131_v18 = vpop.f32.mrf.mxu1 }
 0x48e   :  { %v3090_v27 = vpop.f32.mrf.mxu1 }
 0x4f2   :  { %v2223_v54 = vpop.permute.xlu0 %2222 }
 0x4f3   :  { %v2231_v5 = vmul.f32 %v2223_v54, %v2206_v40  ;;  %v2234_v25 = vmul.f32 %v2223_v54, %v2209_v1  ;;  %v2237_v3 = vmul.f32 %v2223_v54, %v2214_v62 }
 0x4f5   :  { %3108 = vmatmul.mubr.msk.f32.vlgmr.msra.gmra.mxu1 %vm200_vm1, %v2231_v5 }
 0x4f6   :  { %v2225_v43 = vpop.permute.xlu1 %2224  ;;  %3110 = vmatprep.mubr.msk.f32.mxu1 %vm3484_vm0, %v4294_v19  ;;  %v2227_v28 = vpop.permute.xlu0 %2226 }
 0x4f7   :  { %v2232_v2 = vmul.f32 %v2225_v43, %v2206_v40  ;;  %v2233_v48 = vmul.f32 %v2227_v28, %v2206_v40  ;;  %v2235_v21 = vmul.f32 %v2225_v43, %v2209_v1  ;;  %v2236_v51 = vmul.f32 %v2227_v28, %v2209_v1 }
 0x4f8   :  { %v2238_v36 = vmul.f32 %v2225_v43, %v2214_v62  ;;  %v2239_v44 = vmul.f32 %v2227_v28, %v2214_v62 }
 0x4f9   :  { %3111 = vmatmul.mubr.msk.f32.gmra.mxu1 %vm200_vm1, %v2232_v2 }
 0x4fa   :  { %3113 = vmatprep.mubr.msk.f32.mxu1 %vm3484_vm0, %v4294_v19 }
 0x4fd   :  { %3114 = vmatmul.mubr.msk.f32.gmra.mxu1 %vm200_vm1, %v2233_v48 }
 0x4fe   :  { %3116 = vmatprep.mubr.msk.f32.mxu1 %vm3484_vm0, %v4294_v19 }
 0x501   :  { %3117 = vmatmul.mubr.msk.f32.gmra.mxu1 %vm200_vm1, %v2234_v25 }
 0x502   :  { %3119 = vmatprep.mubr.msk.f32.mxu1 %vm3484_vm0, %v4294_v19 }
 0x505   :  { %3120 = vmatmul.mubr.msk.f32.gmra.mxu1 %vm200_vm1, %v2235_v21 }
 0x506   :  { %3122 = vmatprep.mubr.msk.f32.mxu1 %vm3484_vm0, %v4294_v19 }
 0x509   :  { %3123 = vmatmul.mubr.msk.f32.gmra.mxu1 %vm200_vm1, %v2236_v51 }
 0x50a   :  { %3125 = vmatprep.mubr.msk.f32.mxu1 %vm3484_vm0, %v4294_v19 }
 0x50d   :  { %3126 = vmatmul.mubr.msk.f32.gmra.mxu1 %vm200_vm1, %v2237_v3 }
 0x50e   :  { %3128 = vmatprep.mubr.msk.f32.mxu1 %vm3484_vm0, %v4294_v19 }
 0x511   :  { %3129 = vmatmul.mubr.msk.f32.gmra.mxu1 %vm200_vm1, %v2238_v36 }
 0x512   :  { %3131 = vmatprep.mubr.msk.f32.mxu1 %vm3484_vm0, %v4294_v19 }
 0x515   :  { %3132 = vmatmul.mubr.msk.f32.gmra.mxu1 %vm200_vm1, %v2239_v44 }
 0x5b5   :  { %v2333_v63 = vpop.f32.mrf.mxu1 }
 0x5b6   :  { %v2377_v30 = vsel %vm914_vm4, %v2333_v63, -inf }
 0x5b7   :  { %v3109_v56 = vpop.f32.mrf.mxu1 }
 0x5b9   :  { %v2338_v4 = vpop.f32.mrf.mxu1 }
 0x5ba   :  { %v2378_v9 = vsel %vm914_vm4, %v2338_v4, -inf }
 0x5bb   :  { %v3112_v6 = vpop.f32.mrf.mxu1 }
 0x5bd   :  { %v2343_v16 = vpop.f32.mrf.mxu1 }
 0x5be   :  { %v2379_v8 = vsel %vm914_vm4, %v2343_v16, -inf }
 0x5bf   :  { %v2380_v35 = vmax.f32 %v2377_v30, %v2379_v8  ;;  %v3115_v58 = vpop.f32.mrf.mxu1 }
 0x5c1   :  { %v2381_v11 = vmax.f32 %v2380_v35, %v2378_v9  ;;  %v2348_v45 = vpop.f32.mrf.mxu1 }
 0x5c2   :  { %v2382_v12 = vsel %vm914_vm4, %v2348_v45, -inf }
 0x5c3   :  { %v2392_v47 = vsub.f32 %v2333_v63, %v2381_v11  ;;  %v2393_v0 = vsub.f32 %v2338_v4, %v2381_v11  ;;  %v2394_v31 = vsub.f32 %v2343_v16, %v2381_v11  ;;  %v3118_v46 = vpop.f32.mrf.mxu1 }
 0x5c5   :  { %v2401_v50 = vmul.f32 1.442695, %v2392_v47  ;;  %v2403_v7 = vmul.f32 1.442695, %v2393_v0  ;;  %v2405_v55 = vmul.f32 1.442695, %v2394_v31  ;;  %v2353_v49 = vpop.f32.mrf.mxu1 }
 0x5c6   :  { %v2383_v59 = vsel %vm914_vm4, %v2353_v49, -inf }
 0x5c7   :  { %3300 = vpow2.f32 %v2401_v50  ;;  %v3121_v13 = vpop.f32.mrf.mxu1 }
 0x5c8   :  { %3302 = vpow2.f32 %v2403_v7 }
 0x5c9   :  { %3304 = vpow2.f32 %v2405_v55  ;;  %v2358_v41 = vpop.f32.mrf.mxu1 }
 0x5ca   :  { %v2384_v17 = vsel %vm914_vm4, %v2358_v41, -inf }
 0x5cb   :  { %v2385_v34 = vmax.f32 %v2382_v12, %v2384_v17  ;;  %v3124_v52 = vpop.f32.mrf.mxu1 }
 0x5cd   :  { %v2386_v42 = vmax.f32 %v2385_v34, %v2383_v59  ;;  %v2363_v61 = vpop.f32.mrf.mxu1 }
 0x5ce   :  { %v2387_v1 = vsel %vm914_vm4, %v2363_v61, -inf }
 0x5cf   :  { %v2395_v33 = vsub.f32 %v2348_v45, %v2386_v42  ;;  %v2396_v20 = vsub.f32 %v2353_v49, %v2386_v42  ;;  %v2397_v10 = vsub.f32 %v2358_v41, %v2386_v42  ;;  %v3127_v24 = vpop.f32.mrf.mxu1  ;;  %v3202_v42 = vld [vmem:[#allocation7 + $0x8] sm:$0xff]  }
 0x5d0   :  { %3163 = vmatprep.subr.bf16.mxu1 %v3202_v42 }
 0x5d1   :  { %v2407_v32 = vmul.f32 1.442695, %v2395_v33  ;;  %v2409_v22 = vmul.f32 1.442695, %v2396_v20  ;;  %v2411_v57 = vmul.f32 1.442695, %v2397_v10  ;;  %v2368_v15 = vpop.f32.mrf.mxu1  ;;  %3164 = vmatpush3.bf16.msra.mxu1 %v3202_v42 }
 0x5d2   :  { %v2388_v43 = vsel %vm914_vm4, %v2368_v15, -inf }
 0x5d3   :  { %3306 = vpow2.f32 %v2407_v32  ;;  %v3130_v26 = vpop.f32.mrf.mxu1 }
 0x5d4   :  { %v3301_v23 = vpop.eup %3300  ;;  %3308 = vpow2.f32 %v2409_v22  ;;  %v2584_v22 = vpop.permute.xlu1 %2583 }
 0x5d5   :  { %v3303_v60 = vpop.eup %3302  ;;  %v2419_v40 = vsel %vm914_vm4, %v3301_v23, 0.0  ;;  %3310 = vpow2.f32 %v2411_v57  ;;  %v2373_v38 = vpop.f32.mrf.mxu1 }
 0x5d6   :  { %v3305_v37 = vpop.eup %3304  ;;  %v2420_v62 = vsel %vm914_vm4, %v3303_v60, 0.0  ;;  %v2389_v53 = vsel %vm914_vm4, %v2373_v38, -inf  ;;  %v2586_v26 = vpop.permute.xlu0 %2585 }
 0x5d7   :  { %v2421_v18 = vadd.f32 %v2420_v62, %v2419_v40  ;;  %v2390_v27 = vmax.f32 %v2387_v1, %v2389_v53  ;;  %v3133_v54 = vpop.f32.mrf.mxu1  ;;  %v2422_v5 = vsel %vm914_vm4, %v3305_v37, 0.0 }
 0x5d9   :  { %v2423_v2 = vadd.f32 %v2422_v5, %v2421_v18  ;;  %v2391_v28 = vmax.f32 %v2390_v27, %v2388_v43 }
 0x5db   :  { %3312 = vrcp.f32 %v2423_v2  ;;  %v2398_v48 = vsub.f32 %v2363_v61, %v2391_v28  ;;  %v2399_v25 = vsub.f32 %v2368_v15, %v2391_v28  ;;  %v2400_v21 = vsub.f32 %v2373_v38, %v2391_v28  ;;  %v3203_v61 = vld [vmem:[#allocation7] sm:$0xff]  }
 0x5dc   :  { %3165 = vmatprep.subr.bf16.mxu1 %v3203_v61 }
 0x5dd   :  { %v2413_v51 = vmul.f32 1.442695, %v2398_v48  ;;  %v2415_v3 = vmul.f32 1.442695, %v2399_v25  ;;  %v2417_v36 = vmul.f32 1.442695, %v2400_v21  ;;  %3166 = vmatpush3.bf16.msra.mxu1 %v3203_v61 }
 0x5df   :  { %3314 = vpow2.f32 %v2413_v51 }
 0x5e0   :  { %v3307_v44 = vpop.eup %3306  ;;  %3316 = vpow2.f32 %v2415_v3 }
 0x5e1   :  { %v3309_v63 = vpop.eup %3308  ;;  %v2424_v56 = vsel %vm914_vm4, %v3307_v44, 0.0  ;;  %3318 = vpow2.f32 %v2417_v36 }
 0x5e2   :  { %v3311_v4 = vpop.eup %3310  ;;  %v2425_v6 = vsel %vm914_vm4, %v3309_v63, 0.0 }
 0x5e3   :  { %v2426_v16 = vadd.f32 %v2425_v6, %v2424_v56  ;;  %v2427_v30 = vsel %vm914_vm4, %v3311_v4, 0.0 }
 0x5e5   :  { %v2428_v8 = vadd.f32 %v2427_v30, %v2426_v16 }
 0x5e7   :  { %3320 = vrcp.f32 %v2428_v8 }
 0x5e8   :  { %v3313_v35 = vpop.eup %3312 }
 0x5e9   :  { %v2435_v58 = vmul.f32 %v3313_v35, %v3301_v23  ;;  %v2436_v47 = vmul.f32 %v3313_v35, %v3303_v60  ;;  %v2437_v55 = vmul.f32 %v3313_v35, %v3305_v37  ;;  %v2588_v60 = vpop.permute.xlu1 %2587 }
 0x5eb   :  { %3137 = vmatmul.mubr.msk.f32.vlgmr.msra.gmra.mxu0 %vm914_vm4, %v2435_v58 }
 0x5ec   :  { %v3315_v9 = vpop.eup %3314  ;;  %3139 = vmatprep.mubr.msk.f32.mxu0 %vm3484_vm0, %v4294_v19 }
 0x5ed   :  { %v3317_v11 = vpop.eup %3316  ;;  %v2429_v45 = vsel %vm914_vm4, %v3315_v9, 0.0 }
 0x5ee   :  { %v3319_v0 = vpop.eup %3318  ;;  %v2430_v31 = vsel %vm914_vm4, %v3317_v11, 0.0 }
 0x5ef   :  { %v2431_v46 = vadd.f32 %v2430_v31, %v2429_v45  ;;  %3140 = vmatmul.mubr.msk.f32.gmra.mxu0 %vm914_vm4, %v2436_v47  ;;  %v2432_v50 = vsel %vm914_vm4, %v3319_v0, 0.0 }
 0x5f0   :  { %3142 = vmatprep.mubr.msk.f32.mxu0 %vm3484_vm0, %v4294_v19 }
 0x5f1   :  { %v2433_v7 = vadd.f32 %v2432_v50, %v2431_v46  ;;  %v2810_v46 = vld [vmem:[%s4276_s8 + $0x2] ss:$0 sm:$0xff]  ;;  %v2850_v50 = vld [vmem:[#allocation8] ss:$0 sm:$0xff] }
 0x5f3   :  { %3322 = vrcp.f32 %v2433_v7  ;;  %3143 = vmatmul.mubr.msk.f32.gmra.mxu0 %vm914_vm4, %v2437_v55  ;;  %v2808_v7 = vld [vmem:[%s4276_s8] ss:$0 sm:$0xff] }
 0x5f4   :  { %v3321_v49 = vpop.eup %3320  ;;  %3145 = vmatprep.mubr.msk.f32.mxu0 %vm3484_vm0, %v4294_v19 }
 0x5f5   :  { %v2439_v13 = vmul.f32 %v3321_v49, %v3307_v44  ;;  %v2440_v41 = vmul.f32 %v3321_v49, %v3309_v63  ;;  %v2441_v12 = vmul.f32 %v3321_v49, %v3311_v4  ;;  %v2129_v49 = vadd.f32 %v2810_v46, %v4169_v39 }
 0x5f7   :  { %3146 = vmatmul.mubr.msk.f32.gmra.mxu0 %vm914_vm4, %v2439_v13 }
 0x5f8   :  { %3148 = vmatprep.mubr.msk.f32.mxu0 %vm3484_vm0, %v4294_v19 }
 0x5fb   :  { %3149 = vmatmul.mubr.msk.f32.gmra.mxu0 %vm914_vm4, %v2440_v41 }
 0x5fc   :  { %3151 = vmatprep.mubr.msk.f32.mxu0 %vm3484_vm0, %v4294_v19 }
 0x5ff   :  { %3152 = vmatmul.mubr.msk.f32.gmra.mxu0 %vm914_vm4, %v2441_v12  ;;  %v1971_v12 = vadd.f32 %v2808_v7, %v4157_v29 }
 0x600   :  { %v3323_v17 = vpop.eup %3322  ;;  %3154 = vmatprep.mubr.msk.f32.mxu0 %vm3484_vm0, %v4294_v19 }
 0x601   :  { %v2443_v34 = vmul.f32 %v3323_v17, %v3315_v9  ;;  %v2444_v52 = vmul.f32 %v3323_v17, %v3317_v11  ;;  %v2445_v59 = vmul.f32 %v3323_v17, %v3319_v0 }
 0x603   :  { %3155 = vmatmul.mubr.msk.f32.gmra.mxu0 %vm914_vm4, %v2443_v34 }
 0x604   :  { %3157 = vmatprep.mubr.msk.f32.mxu0 %vm3484_vm0, %v4294_v19 }
 0x607   :  { %3158 = vmatmul.mubr.msk.f32.gmra.mxu0 %vm914_vm4, %v2444_v52  ;;  %v2809_v52 = vld [vmem:[%s4276_s8 + $0x1] ss:$0 sm:$0xff]  ;;  %s3445_s8 = scalar_lea.vmem %s2727_s29, 128 }
 0x608   :  { %3160 = vmatprep.mubr.msk.f32.mxu0 %vm3484_vm0, %v4294_v19  ;;  %vm2716_vm0 = vcmask 523264   ;;  %p3446_p2 = scmp.ne.s32.totalorder %s2727_s29, %s3445_s8  ;;  %p3451_p4 = scmp.lt.s32.totalorder %s3445_s8, %s3445_s8 }
 0x60a   :  { %p3452_p5 = por %p3451_p4, %p3450_p3 }
 0x60b   :  { %3161 = vmatmul.mubr.msk.f32.gmra.mxu0 %vm914_vm4, %v2445_v59 }
 0x60c   :  { %p3453_p6 = pnand %p3452_p5, %p3446_p2 }
 0x6ab   :  { %v2539_v33 = vpop.f32.mrf.mxu0 }
 0x6ac   :  { %v2592_v38 = vmul.f32 %v2584_v22, %v2539_v33  ;;  %v2050_v33 = vadd.f32 %v2809_v52, %v4159_v14 }
 0x6ad   :  { %v3138_v20 = vpop.f32.mrf.mxu0 }
 0x6ae   :  { %v2601_v5 = vsel %vm200_vm1, %v2592_v38, 0.0 }
 0x6af   :  { %v2544_v10 = vpop.f32.mrf.mxu0 }
 0x6b0   :  { %v2593_v19 = vmul.f32 %v2586_v26, %v2544_v10 }
 0x6b1   :  { %v3141_v24 = vpop.f32.mrf.mxu0 }
 0x6b2   :  { %v2602_v18 = vsel %vm200_vm1, %v2593_v19, 0.0 }
 0x6b3   :  { %v2549_v32 = vpop.f32.mrf.mxu0  ;;  %v2603_v48 = vadd.f32 %v2602_v18, %v2601_v5 }
 0x6b4   :  { %v2594_v37 = vmul.f32 %v2588_v60, %v2549_v32 }
 0x6b5   :  { %v3144_v57 = vpop.f32.mrf.mxu0 }
 0x6b6   :  { %v2604_v43 = vsel %vm200_vm1, %v2594_v37, 0.0 }
 0x6b7   :  { %v2554_v15 = vpop.f32.mrf.mxu0  ;;  %v2605_v3 = vadd.f32 %v2604_v43, %v2603_v48 }
 0x6b8   :  { %v2595_v62 = vmul.f32 %v2584_v22, %v2554_v15 }
 0x6b9   :  { %v3147_v23 = vpop.f32.mrf.mxu0 }
 0x6ba   :  { %v2606_v2 = vsel %vm200_vm1, %v2595_v62, 0.0 }
 0x6bb   :  { %v2559_v40 = vpop.f32.mrf.mxu0 }
 0x6bc   :  { %v2596_v1 = vmul.f32 %v2586_v26, %v2559_v40 }
 0x6bd   :  { %v3150_v53 = vpop.f32.mrf.mxu0 }
 0x6be   :  { %v2607_v27 = vsel %vm200_vm1, %v2596_v1, 0.0 }
 0x6bf   :  { %v2564_v54 = vpop.f32.mrf.mxu0  ;;  %v2608_v25 = vadd.f32 %v2607_v27, %v2606_v2 }
 0x6c0   :  { %v2597_v28 = vmul.f32 %v2588_v60, %v2564_v54 }
 0x6c1   :  { %v3153_v21 = vpop.f32.mrf.mxu0 }
 0x6c2   :  { %v2609_v51 = vsel %vm200_vm1, %v2597_v28, 0.0 }
 0x6c3   :  { %v2610_v36 = vadd.f32 %v2609_v51, %v2608_v25  ;;  %v2569_v44 = vpop.f32.mrf.mxu0 }
 0x6c4   :  { %v2598_v6 = vmul.f32 %v2584_v22, %v2569_v44 }
 0x6c5   :  { %v2857_v63 = vpack.c.bf16 %v2610_v36, %v2605_v3  ;;  %v3156_v56 = vpop.f32.mrf.mxu0 }
 0x6c6   :  { %v2611_v58 = vsel %vm200_vm1, %v2598_v6, 0.0 }
 0x6c7   :  { %v2574_v4 = vpop.f32.mrf.mxu0  ;;  %3167 = vmatprep.mubr.msk.bf16.mxu1 %vm200_vm1, %v2857_v63 }
 0x6c8   :  { %v2599_v16 = vmul.f32 %v2586_v26, %v2574_v4 }
 0x6c9   :  { %v3159_v30 = vpop.f32.mrf.mxu0 }
 0x6ca   :  { %v2612_v8 = vsel %vm200_vm1, %v2599_v16, 0.0 }
 0x6cb   :  { %v2579_v35 = vpop.f32.mrf.mxu0  ;;  %v2613_v11 = vadd.f32 %v2612_v8, %v2611_v58 }
 0x6cc   :  { %v2600_v9 = vmul.f32 %v2588_v60, %v2579_v35 }
 0x6cd   :  { %v3162_v45 = vpop.f32.mrf.mxu0 }
 0x6ce   :  { %v2614_v47 = vsel %vm200_vm1, %v2600_v9, 0.0 }
 0x6cf   :  { %v2615_v0 = vadd.f32 %v2614_v47, %v2613_v11 }
 0x6d1   :  { %v2858_v31 = vpack.c.bf16 %v2615_v0, %v2615_v0 }
 0x6d3   :  { %3168 = vmatmul.mubr.msk.bf16.vlgmr.msra.gmra.mxu1 %vm200_vm1, %v2858_v31 }
 0x793   :  { %v3169_v55 = vpop.f32.mrf.mxu1 }
 0x794   :  { %v2699_v13 = vadd.f32 %v3169_v55, %v2850_v50 }
 0x795   :  { %v2690_v41 = vpop.f32.mrf.mxu1 }
 0x796   :  { %v2691_v17 = vadd.f32 %v2850_v50, %v2690_v41  ;;  %v2706_v34 = vmul.f32 %v2699_v13, %v2129_v49 }
 0x797   :  { %v3170_v59 = vpop.f32.mrf.mxu1 }
 0x798   :  { %v2704_v42 = vmul.f32 %v2691_v17, %v1971_v12  ;;  %2712 = vrot.lane.b32.xlu1 %v2706_v34, %s3477_s14 }
 0x799   :  { %v2693_v61 = vpop.f32.mrf.mxu1 }
 0x79a   :  { %v2694_v20 = vadd.f32 %v2850_v50, %v2693_v61 }
 0x79c   :  { %v2705_v10 = vmul.f32 %v2694_v20, %v2050_v33 }
 0x79e   :  { %2708 = vrot.lane.b32.xlu0 %v2705_v10, %s3488_s4 }
 0x80a   :  { %v2713_v39 = vpop.permute.xlu1 %2712 }
 0x810   :  { %v2709_v29 = vpop.permute.xlu0 %2708 }
 0x811   :  { %v2715_v24 = vsel %vm200_vm1, %v2704_v42, %v2709_v29 }
 0x812   :  { %v2717_v32 = vsel %vm2716_vm0, %v2715_v24, %v2713_v39 }
 0x813   :  { %2719 = vst.msk [vmem:[#allocation13] sm:$0xff] %vm2718_vm8, %v2717_v32 }
 0x814   :  { %3456 = shalt.err (!%p3453_p6)
}
 0x815   :  { %2729 = dma.vmem_to_hbm [thread:$0]  %s2727_s29, 128, %s4277_s9, [#allocation4]  }
 0x816   :  { %3473 = dma.done.wait [#allocation4], 128  }
 0x817   :  { %3474 = vsyncadd [#allocation4], 4294967168 }
 0x818   :  { %2733 = vsyncpa [#allocation3], 1 }
 0x819   :  { %2734 = vsyncpa [#allocation6], 1 }
 0x81a   :  { %2735 = vsyncpa [#allocation9], 1 }
 0x81b   :  { %2736 = vsyncpa [#allocation12], 1 }
 0x81c   :  { %2737 = vsyncpa [#allocation4], 1 }

</bundles_post_ra>
